<compile_context>
chip_gen: v7x
topology: tpu7x:2x2x1
jax: 0.10.0
libtpu: 0.0.40
codegen_flags: <defaults>
</compile_context>

<pallas_src>
import jax
import jax.numpy as jnp
from jax import lax
from jax.experimental import pallas as pl
from jax.experimental.pallas import tpu as pltpu

EPS = 1e-5  # PyTorch BatchNorm1d default eps


# ----------------------------- Pallas kernel --------------------------------

def divfree_kernel(xin_ref, wstack_ref, vstack_ref, out_ref):
    x = xin_ref[...]                          # (B, P) f32, P == H (zero-padded cols)
    inv_n = 1.0 / x.shape[0]                  # static python float

    # weight stack rows: w1_pad, w2, w3, w1t_pad, w2t, w3t  (all (H, H), f32)
    w1, w2, w3 = wstack_ref[0], wstack_ref[1], wstack_ref[2]
    w1t, w2t, w3t = wstack_ref[3], wstack_ref[4], wstack_ref[5]

    # vector stack rows: b1,g1,be1, b2,g2,be2, b3,g3,be3, w4row  (all (1, H), f32)
    b1, g1, be1 = vstack_ref[0:1, :], vstack_ref[1:2, :], vstack_ref[2:3, :]
    b2, g2, be2 = vstack_ref[3:4, :], vstack_ref[4:5, :], vstack_ref[5:6, :]
    b3, g3, be3 = vstack_ref[6:7, :], vstack_ref[7:8, :], vstack_ref[8:9, :]
    w4row = vstack_ref[9:10, :]               # last Linear weight as a (1, H) row
    H = w2.shape[0]

    def bn_tanh_fwd(z, gamma, beta):
        # training-mode BatchNorm1d (biased batch variance) + tanh; stable form.
        mu = jnp.sum(z, axis=0, keepdims=True) * inv_n
        d = z - mu
        var = jnp.sum(d * d, axis=0, keepdims=True) * inv_n
        rstd = lax.rsqrt(var + EPS)
        zhat = d * rstd
        a = jnp.tanh(gamma * zhat + beta)
        return a, zhat, gamma * rstd          # gamma*rstd folded once per layer

    def bn_tanh_bwd(g_a, a, zhat, grstd):
        # tanh' then BN backward with gradients flowing through batch mean/var:
        #   g_z = gamma*rstd * (g_y - mean(g_y) - zhat * mean(g_y * zhat))
        # Both means computed with ONE cross-sublane reduction (lane-concat trick).
        g_y = g_a * (1.0 - a * a)
        both = jnp.concatenate([g_y, g_y * zhat], axis=-1)        # (B, 2H)
        m = jnp.sum(both, axis=0, keepdims=True) * inv_n          # (1, 2H)
        return grstd * (g_y - m[:, :H] - zhat * m[:, H:])

    # ----- forward (keep residuals needed for the analytic backward) -----
    z1 = jnp.dot(x, w1, preferred_element_type=jnp.float32) + b1
    a1, zh1, gr1 = bn_tanh_fwd(z1, g1, be1)
    z2 = jnp.dot(a1, w2, preferred_element_type=jnp.float32) + b2
    a2, zh2, gr2 = bn_tanh_fwd(z2, g2, be2)
    z3 = jnp.dot(a2, w3, preferred_element_type=jnp.float32) + b3
    a3, zh3, gr3 = bn_tanh_fwd(z3, g3, be3)

    # ----- backward: d(sum energy)/d xin -----
    # d(sum energy)/d a3 = w4 row, broadcast (1,H) -> (B,H) implicitly.
    g_z3 = bn_tanh_bwd(w4row, a3, zh3, gr3)
    g_a2 = jnp.dot(g_z3, w3t, preferred_element_type=jnp.float32)
    g_z2 = bn_tanh_bwd(g_a2, a2, zh2, gr2)
    g_a1 = jnp.dot(g_z2, w2t, preferred_element_type=jnp.float32)
    g_z1 = bn_tanh_bwd(g_a1, a1, zh1, gr1)
    # Full (B, P) gradient slab (padded columns are exactly zero); the [:, :-1]
    # column selection is a free XLA view in the wrapper.
    out_ref[...] = jnp.dot(g_z1, w1t, preferred_element_type=jnp.float32)


# ------------------------------ wrappers --------------------------------------

def divergence_free_net_steps(ts, xs, packed_params):
    """Batched over integrator steps.

    ts: (S,) scalars, xs: (S, B, dim). Returns (S, B, dim) gradients
    d(sum energy)/d cat([t, x]) [:, :-1], one independent BatchNorm per step.
    """
    wstack, vstack = packed_params
    H = wstack.shape[-1]
    P = H                                      # dim+1 zero-padded up to H
    S, B, dim = xs.shape
    assert dim + 1 <= P

    t_col = jnp.broadcast_to(ts.astype(jnp.float32)[:, None, None], (S, B, 1))
    pad = jnp.zeros((S, B, P - dim - 1), jnp.float32)
    xin = jnp.concatenate([t_col, xs.astype(jnp.float32), pad], axis=-1)  # (S, B, P)

    grad_full = pl.pallas_call(
        divfree_kernel,
        out_shape=jax.ShapeDtypeStruct((S, B, P), jnp.float32),
        grid_spec=pltpu.PrefetchScalarGridSpec(
            num_scalar_prefetch=0,
            grid=(S,),
            in_specs=[
                # per-step input tile: pipelined (double-buffered) across the grid
                pl.BlockSpec((None, B, P), lambda s: (s, 0, 0)),
                # weights: constant block index -> VMEM-resident across all steps
                pl.BlockSpec((6, H, H), lambda s: (0, 0, 0)),
                pl.BlockSpec((10, H), lambda s: (0, 0)),
            ],
            out_specs=pl.BlockSpec((None, B, P), lambda s: (s, 0, 0)),
        ),
        compiler_params=pltpu.CompilerParams(
            dimension_semantics=("parallel",)),   # steps independent -> v7x megacore
    )(xin, wstack, vstack)

    # grad w.r.t. cat([t, x]) lives in columns 0..dim; torch returns grad[:, :-1].
    return grad_full[:, :, :dim]


def divergence_free_net(t, x, packed_params):
    """Single step, matching the module's forward(t, x) signature (scalar t)."""
    ts = jnp.asarray(t, jnp.float32).reshape(1)
    return divergence_free_net_steps(ts, x[None], packed_params)[0]


# --------------------- deterministic parameter init --------------------------

def init_params(key, dim, hidden):
    """PyTorch-style init: Linear W,b ~ U(-1/sqrt(fan_in), ..), BN gamma=1, beta=0."""
    dims = [dim + 1, hidden, hidden, hidden, 1]
    linears = []
    for i in range(4):
        key, kw, kb = jax.random.split(key, 3)
        bound = 1.0 / (dims[i] ** 0.5)
        w = jax.random.uniform(kw, (dims[i], dims[i + 1]), jnp.float32, -bound, bound)
        b = jax.random.uniform(kb, (1, dims[i + 1]), jnp.float32, -bound, bound)
        linears.append((w, b))
    (w1, b1), (w2, b2), (w3, b3), (w4, b4) = linears
    g = jnp.ones((1, hidden), jnp.float32)
    be = jnp.zeros((1, hidden), jnp.float32)
    return (w1, b1, g, be, w2, b2, g, be, w3, b3, g, be, w4, b4)


def pack_params(ref_params, dim):
    """Collapse 14 parameters into 2 kernel inputs (wstack, vstack).

    w1 / w1.T are zero-padded from (dim+1, H) to (H, H) so they fold into one
    uniform (6, H, H) stack; the zero rows/cols keep the math exact.
    """
    w1, b1, g1, be1, w2, b2, g2, be2, w3, b3, g3, be3, w4, b4 = ref_params
    H = w2.shape[0]
    assert dim + 1 <= H, "input width must fit in the padded (H, H) weight tile"
    w1_pad = jnp.zeros((H, H), jnp.float32).at[: dim + 1, :].set(w1)
    wstack = jnp.stack([w1_pad, w2, w3, w1_pad.T, w2.T, w3.T]).astype(jnp.float32)
    vstack = jnp.concatenate([b1, g1, be1, b2, g2, be2, b3, g3, be3, w4.T],
                             axis=0).astype(jnp.float32)          # (10, H)
    # b4 is irrelevant for d(energy)/d(input).
    return (wstack, vstack)


# ----------------------- pure-JAX reference (autograd) -----------------------

def _energy_ref(xin, p):
    w1, b1, g1, be1, w2, b2, g2, be2, w3, b3, g3, be3, w4, b4 = p
    hp = lax.Precision.HIGHEST

    def bn_tanh(z, g, be):
        mu = jnp.mean(z, axis=0, keepdims=True)
        var = jnp.mean((z - mu) ** 2, axis=0, keepdims=True)
        return jnp.tanh(g * (z - mu) / jnp.sqrt(var + EPS) + be)

    a1 = bn_tanh(jnp.dot(xin, w1, precision=hp) + b1, g1, be1)
    a2 = bn_tanh(jnp.dot(a1, w2, precision=hp) + b2, g2, be2)
    a3 = bn_tanh(jnp.dot(a2, w3, precision=hp) + b3, g3, be3)
    return jnp.dot(a3, w4, precision=hp) + b4                     # (B, 1)


def reference(t, x, ref_params):
    B, dim = x.shape
    t_col = jnp.full((B, 1), jnp.asarray(t, jnp.float32), jnp.float32)
    xin = jnp.concatenate([t_col, x], axis=-1)
    grad = jax.grad(lambda xi: jnp.sum(_energy_ref(xi, ref_params)))(xin)
    return grad[:, :-1]


# ---------------------------------- main --------------------------------------

if __name__ == "__main__":
    B, DIM, HIDDEN, STEPS = 64, 4, 32, 8    # small shapes; STEPS amortizes launch cost

    key = jax.random.PRNGKey(0)
    kp, kx = jax.random.split(key)
    ref_params = init_params(kp, DIM, HIDDEN)
    packed_params = pack_params(ref_params, DIM)

    xs = jax.random.normal(kx, (STEPS, B, DIM), jnp.float32)
    ts = jnp.linspace(0.0, 1.0, STEPS, dtype=jnp.float32)

    # Step-batched call (one pallas_call, grid over STEPS, weights VMEM-resident).
    out = jax.jit(divergence_free_net_steps)(ts, xs, packed_params)
    out = jax.block_until_ready(out)
    assert out.shape == (STEPS, B, DIM), out.shape
    assert bool(jnp.all(jnp.isfinite(out)))

    # Per-step autodiff reference (BN stats computed independently per step).
    ref = jnp.stack([reference(ts[s], xs[s], ref_params) for s in range(STEPS)])
    rel_err = float(jnp.linalg.norm(out - ref) / jnp.linalg.norm(ref))
    assert rel_err < 5e-3, rel_err

    # Single-step path matching the module's forward(t, x) signature.
    out1 = jax.jit(divergence_free_net)(jnp.float32(0.5), xs[0], packed_params)
    out1 = jax.block_until_ready(out1)
    assert out1.shape == (B, DIM), out1.shape
    assert bool(jnp.all(jnp.isfinite(out1)))

    print("KERNEL_OK")
</pallas_src>

<mosaic_0001>
module attributes {stable_mosaic.version = 11 : i64} {
  func.func @divfree_kernel(%arg0: i32, %arg1: memref<1x64x32xf32, #tpu.memory_space<vmem>>, %arg2: memref<6x32x32xf32, #tpu.memory_space<vmem>>, %arg3: memref<10x32xf32, #tpu.memory_space<vmem>>, %arg4: memref<1x64x32xf32, #tpu.memory_space<vmem>>) attributes {dimension_semantics = [#tpu.dimension_semantics<parallel>], iteration_bounds = array<i64: 8>, scalar_prefetch = 0 : i64, scratch_operands = 0 : i64, tpu.core_type = #tpu.core_type<tc>, window_params = [{transform_indices = @transform_0, window_bounds = array<i64: 1, 64, 32>}, {pipeline_mode = #tpu.pipeline_mode<synchronous>, transform_indices = @transform_1, window_bounds = array<i64: 6, 32, 32>}, {pipeline_mode = #tpu.pipeline_mode<synchronous>, transform_indices = @transform_2, window_bounds = array<i64: 10, 32>}, {transform_indices = @transform_3, window_bounds = array<i64: 1, 64, 32>}]} {
    %c0 = arith.constant 0 : index
    %c0_0 = arith.constant 0 : index
    %c0_1 = arith.constant 0 : index
    %0 = vector.load %arg1[%c0, %c0_0, %c0_1] : memref<1x64x32xf32, #tpu.memory_space<vmem>>, vector<1x64x32xf32>
    %1 = vector.shape_cast %0 : vector<1x64x32xf32> to vector<64x32xf32>
    %c0_2 = arith.constant 0 : index
    %c0_3 = arith.constant 0 : index
    %c0_4 = arith.constant 0 : index
    %2 = vector.load %arg2[%c0_2, %c0_3, %c0_4] : memref<6x32x32xf32, #tpu.memory_space<vmem>>, vector<1x32x32xf32>
    %3 = vector.shape_cast %2 : vector<1x32x32xf32> to vector<32x32xf32>
    %c1 = arith.constant 1 : index
    %c0_5 = arith.constant 0 : index
    %c0_6 = arith.constant 0 : index
    %4 = vector.load %arg2[%c1, %c0_5, %c0_6] : memref<6x32x32xf32, #tpu.memory_space<vmem>>, vector<1x32x32xf32>
    %5 = vector.shape_cast %4 : vector<1x32x32xf32> to vector<32x32xf32>
    %c2 = arith.constant 2 : index
    %c0_7 = arith.constant 0 : index
    %c0_8 = arith.constant 0 : index
    %6 = vector.load %arg2[%c2, %c0_7, %c0_8] : memref<6x32x32xf32, #tpu.memory_space<vmem>>, vector<1x32x32xf32>
    %7 = vector.shape_cast %6 : vector<1x32x32xf32> to vector<32x32xf32>
    %c3 = arith.constant 3 : index
    %c0_9 = arith.constant 0 : index
    %c0_10 = arith.constant 0 : index
    %8 = vector.load %arg2[%c3, %c0_9, %c0_10] : memref<6x32x32xf32, #tpu.memory_space<vmem>>, vector<1x32x32xf32>
    %9 = vector.shape_cast %8 : vector<1x32x32xf32> to vector<32x32xf32>
    %c4 = arith.constant 4 : index
    %c0_11 = arith.constant 0 : index
    %c0_12 = arith.constant 0 : index
    %10 = vector.load %arg2[%c4, %c0_11, %c0_12] : memref<6x32x32xf32, #tpu.memory_space<vmem>>, vector<1x32x32xf32>
    %11 = vector.shape_cast %10 : vector<1x32x32xf32> to vector<32x32xf32>
    %c5 = arith.constant 5 : index
    %c0_13 = arith.constant 0 : index
    %c0_14 = arith.constant 0 : index
    %12 = vector.load %arg2[%c5, %c0_13, %c0_14] : memref<6x32x32xf32, #tpu.memory_space<vmem>>, vector<1x32x32xf32>
    %13 = vector.shape_cast %12 : vector<1x32x32xf32> to vector<32x32xf32>
    %c0_15 = arith.constant 0 : index
    %c0_16 = arith.constant 0 : index
    %14 = vector.load %arg3[%c0_15, %c0_16] : memref<10x32xf32, #tpu.memory_space<vmem>>, vector<1x32xf32>
    %c1_17 = arith.constant 1 : index
    %c0_18 = arith.constant 0 : index
    %15 = vector.load %arg3[%c1_17, %c0_18] : memref<10x32xf32, #tpu.memory_space<vmem>>, vector<1x32xf32>
    %c2_19 = arith.constant 2 : index
    %c0_20 = arith.constant 0 : index
    %16 = vector.load %arg3[%c2_19, %c0_20] : memref<10x32xf32, #tpu.memory_space<vmem>>, vector<1x32xf32>
    %c3_21 = arith.constant 3 : index
    %c0_22 = arith.constant 0 : index
    %17 = vector.load %arg3[%c3_21, %c0_22] : memref<10x32xf32, #tpu.memory_space<vmem>>, vector<1x32xf32>
    %c4_23 = arith.constant 4 : index
    %c0_24 = arith.constant 0 : index
    %18 = vector.load %arg3[%c4_23, %c0_24] : memref<10x32xf32, #tpu.memory_space<vmem>>, vector<1x32xf32>
    %c5_25 = arith.constant 5 : index
    %c0_26 = arith.constant 0 : index
    %19 = vector.load %arg3[%c5_25, %c0_26] : memref<10x32xf32, #tpu.memory_space<vmem>>, vector<1x32xf32>
    %c6 = arith.constant 6 : index
    %c0_27 = arith.constant 0 : index
    %20 = vector.load %arg3[%c6, %c0_27] : memref<10x32xf32, #tpu.memory_space<vmem>>, vector<1x32xf32>
    %c7 = arith.constant 7 : index
    %c0_28 = arith.constant 0 : index
    %21 = vector.load %arg3[%c7, %c0_28] : memref<10x32xf32, #tpu.memory_space<vmem>>, vector<1x32xf32>
    %c8 = arith.constant 8 : index
    %c0_29 = arith.constant 0 : index
    %22 = vector.load %arg3[%c8, %c0_29] : memref<10x32xf32, #tpu.memory_space<vmem>>, vector<1x32xf32>
    %c9 = arith.constant 9 : index
    %c0_30 = arith.constant 0 : index
    %23 = vector.load %arg3[%c9, %c0_30] : memref<10x32xf32, #tpu.memory_space<vmem>>, vector<1x32xf32>
    %cst = arith.constant dense<0.000000e+00> : vector<64x32xf32>
    %24 = tpu.matmul %1, %3, %cst {dimension_numbers = #tpu.dot_dimension_numbers<[1], [0], [0], [1], [0, 0, 1, 1], [], []>} : vector<64x32xf32>, vector<32x32xf32>, vector<64x32xf32> -> vector<64x32xf32>
    %25 = vector.broadcast %14 : vector<1x32xf32> to vector<64x32xf32>
    %26 = arith.addf %24, %25 : vector<64x32xf32>
    %cst_31 = arith.constant dense<0.000000e+00> : vector<32xf32>
    %27 = vector.multi_reduction <add>, %26, %cst_31 [0] : vector<64x32xf32> to vector<32xf32>
    %28 = vector.shape_cast %27 : vector<32xf32> to vector<1x32xf32>
    %cst_32 = arith.constant 1.562500e-02 : f32
    %29 = vector.broadcast %cst_32 : f32 to vector<1x32xf32>
    %30 = arith.mulf %28, %29 : vector<1x32xf32>
    %31 = vector.broadcast %30 : vector<1x32xf32> to vector<64x32xf32>
    %32 = arith.subf %26, %31 : vector<64x32xf32>
    %33 = arith.mulf %32, %32 : vector<64x32xf32>
    %cst_33 = arith.constant dense<0.000000e+00> : vector<32xf32>
    %34 = vector.multi_reduction <add>, %33, %cst_33 [0] : vector<64x32xf32> to vector<32xf32>
    %35 = vector.shape_cast %34 : vector<32xf32> to vector<1x32xf32>
    %cst_34 = arith.constant 1.562500e-02 : f32
    %36 = vector.broadcast %cst_34 : f32 to vector<1x32xf32>
    %37 = arith.mulf %35, %36 : vector<1x32xf32>
    %cst_35 = arith.constant 9.99999974E-6 : f32
    %38 = vector.broadcast %cst_35 : f32 to vector<1x32xf32>
    %39 = arith.addf %37, %38 : vector<1x32xf32>
    %40 = math.rsqrt %39 : vector<1x32xf32>
    %41 = vector.broadcast %40 : vector<1x32xf32> to vector<64x32xf32>
    %42 = arith.mulf %32, %41 : vector<64x32xf32>
    %43 = vector.broadcast %15 : vector<1x32xf32> to vector<64x32xf32>
    %44 = arith.mulf %43, %42 : vector<64x32xf32>
    %45 = vector.broadcast %16 : vector<1x32xf32> to vector<64x32xf32>
    %46 = arith.addf %44, %45 : vector<64x32xf32>
    %47 = math.tanh %46 : vector<64x32xf32>
    %48 = arith.mulf %15, %40 : vector<1x32xf32>
    %cst_36 = arith.constant dense<0.000000e+00> : vector<64x32xf32>
    %49 = tpu.matmul %47, %5, %cst_36 {dimension_numbers = #tpu.dot_dimension_numbers<[1], [0], [0], [1], [0, 0, 1, 1], [], []>} : vector<64x32xf32>, vector<32x32xf32>, vector<64x32xf32> -> vector<64x32xf32>
    %50 = vector.broadcast %17 : vector<1x32xf32> to vector<64x32xf32>
    %51 = arith.addf %49, %50 : vector<64x32xf32>
    %cst_37 = arith.constant dense<0.000000e+00> : vector<32xf32>
    %52 = vector.multi_reduction <add>, %51, %cst_37 [0] : vector<64x32xf32> to vector<32xf32>
    %53 = vector.shape_cast %52 : vector<32xf32> to vector<1x32xf32>
    %cst_38 = arith.constant 1.562500e-02 : f32
    %54 = vector.broadcast %cst_38 : f32 to vector<1x32xf32>
    %55 = arith.mulf %53, %54 : vector<1x32xf32>
    %56 = vector.broadcast %55 : vector<1x32xf32> to vector<64x32xf32>
    %57 = arith.subf %51, %56 : vector<64x32xf32>
    %58 = arith.mulf %57, %57 : vector<64x32xf32>
    %cst_39 = arith.constant dense<0.000000e+00> : vector<32xf32>
    %59 = vector.multi_reduction <add>, %58, %cst_39 [0] : vector<64x32xf32> to vector<32xf32>
    %60 = vector.shape_cast %59 : vector<32xf32> to vector<1x32xf32>
    %cst_40 = arith.constant 1.562500e-02 : f32
    %61 = vector.broadcast %cst_40 : f32 to vector<1x32xf32>
    %62 = arith.mulf %60, %61 : vector<1x32xf32>
    %cst_41 = arith.constant 9.99999974E-6 : f32
    %63 = vector.broadcast %cst_41 : f32 to vector<1x32xf32>
    %64 = arith.addf %62, %63 : vector<1x32xf32>
    %65 = math.rsqrt %64 : vector<1x32xf32>
    %66 = vector.broadcast %65 : vector<1x32xf32> to vector<64x32xf32>
    %67 = arith.mulf %57, %66 : vector<64x32xf32>
    %68 = vector.broadcast %18 : vector<1x32xf32> to vector<64x32xf32>
    %69 = arith.mulf %68, %67 : vector<64x32xf32>
    %70 = vector.broadcast %19 : vector<1x32xf32> to vector<64x32xf32>
    %71 = arith.addf %69, %70 : vector<64x32xf32>
    %72 = math.tanh %71 : vector<64x32xf32>
    %73 = arith.mulf %18, %65 : vector<1x32xf32>
    %cst_42 = arith.constant dense<0.000000e+00> : vector<64x32xf32>
    %74 = tpu.matmul %72, %7, %cst_42 {dimension_numbers = #tpu.dot_dimension_numbers<[1], [0], [0], [1], [0, 0, 1, 1], [], []>} : vector<64x32xf32>, vector<32x32xf32>, vector<64x32xf32> -> vector<64x32xf32>
    %75 = vector.broadcast %20 : vector<1x32xf32> to vector<64x32xf32>
    %76 = arith.addf %74, %75 : vector<64x32xf32>
    %cst_43 = arith.constant dense<0.000000e+00> : vector<32xf32>
    %77 = vector.multi_reduction <add>, %76, %cst_43 [0] : vector<64x32xf32> to vector<32xf32>
    %78 = vector.shape_cast %77 : vector<32xf32> to vector<1x32xf32>
    %cst_44 = arith.constant 1.562500e-02 : f32
    %79 = vector.broadcast %cst_44 : f32 to vector<1x32xf32>
    %80 = arith.mulf %78, %79 : vector<1x32xf32>
    %81 = vector.broadcast %80 : vector<1x32xf32> to vector<64x32xf32>
    %82 = arith.subf %76, %81 : vector<64x32xf32>
    %83 = arith.mulf %82, %82 : vector<64x32xf32>
    %cst_45 = arith.constant dense<0.000000e+00> : vector<32xf32>
    %84 = vector.multi_reduction <add>, %83, %cst_45 [0] : vector<64x32xf32> to vector<32xf32>
    %85 = vector.shape_cast %84 : vector<32xf32> to vector<1x32xf32>
    %cst_46 = arith.constant 1.562500e-02 : f32
    %86 = vector.broadcast %cst_46 : f32 to vector<1x32xf32>
    %87 = arith.mulf %85, %86 : vector<1x32xf32>
    %cst_47 = arith.constant 9.99999974E-6 : f32
    %88 = vector.broadcast %cst_47 : f32 to vector<1x32xf32>
    %89 = arith.addf %87, %88 : vector<1x32xf32>
    %90 = math.rsqrt %89 : vector<1x32xf32>
    %91 = vector.broadcast %90 : vector<1x32xf32> to vector<64x32xf32>
    %92 = arith.mulf %82, %91 : vector<64x32xf32>
    %93 = vector.broadcast %21 : vector<1x32xf32> to vector<64x32xf32>
    %94 = arith.mulf %93, %92 : vector<64x32xf32>
    %95 = vector.broadcast %22 : vector<1x32xf32> to vector<64x32xf32>
    %96 = arith.addf %94, %95 : vector<64x32xf32>
    %97 = math.tanh %96 : vector<64x32xf32>
    %98 = arith.mulf %21, %90 : vector<1x32xf32>
    %99 = arith.mulf %97, %97 : vector<64x32xf32>
    %cst_48 = arith.constant 1.000000e+00 : f32
    %100 = vector.broadcast %cst_48 : f32 to vector<64x32xf32>
    %101 = arith.subf %100, %99 : vector<64x32xf32>
    %102 = vector.broadcast %23 : vector<1x32xf32> to vector<64x32xf32>
    %103 = arith.mulf %102, %101 : vector<64x32xf32>
    %104 = arith.mulf %103, %92 : vector<64x32xf32>
    %105 = tpu.concatenate %103, %104 in 1 : vector<64x32xf32>, vector<64x32xf32> -> vector<64x64xf32>
    %cst_49 = arith.constant dense<0.000000e+00> : vector<64xf32>
    %106 = vector.multi_reduction <add>, %105, %cst_49 [0] : vector<64x64xf32> to vector<64xf32>
    %107 = vector.shape_cast %106 : vector<64xf32> to vector<1x64xf32>
    %cst_50 = arith.constant 1.562500e-02 : f32
    %108 = vector.broadcast %cst_50 : f32 to vector<1x64xf32>
    %109 = arith.mulf %107, %108 : vector<1x64xf32>
    %110 = vector.extract_strided_slice %109 {offsets = [0, 0], sizes = [1, 32], strides = [1, 1]} : vector<1x64xf32> to vector<1x32xf32>
    %111 = vector.broadcast %110 : vector<1x32xf32> to vector<64x32xf32>
    %112 = arith.subf %103, %111 : vector<64x32xf32>
    %113 = vector.extract_strided_slice %109 {offsets = [0, 32], sizes = [1, 32], strides = [1, 1]} : vector<1x64xf32> to vector<1x32xf32>
    %114 = vector.broadcast %113 : vector<1x32xf32> to vector<64x32xf32>
    %115 = arith.mulf %92, %114 : vector<64x32xf32>
    %116 = arith.subf %112, %115 : vector<64x32xf32>
    %117 = vector.broadcast %98 : vector<1x32xf32> to vector<64x32xf32>
    %118 = arith.mulf %117, %116 : vector<64x32xf32>
    %cst_51 = arith.constant dense<0.000000e+00> : vector<64x32xf32>
    %119 = tpu.matmul %118, %13, %cst_51 {dimension_numbers = #tpu.dot_dimension_numbers<[1], [0], [0], [1], [0, 0, 1, 1], [], []>} : vector<64x32xf32>, vector<32x32xf32>, vector<64x32xf32> -> vector<64x32xf32>
    %120 = arith.mulf %72, %72 : vector<64x32xf32>
    %cst_52 = arith.constant 1.000000e+00 : f32
    %121 = vector.broadcast %cst_52 : f32 to vector<64x32xf32>
    %122 = arith.subf %121, %120 : vector<64x32xf32>
    %123 = arith.mulf %119, %122 : vector<64x32xf32>
    %124 = arith.mulf %123, %67 : vector<64x32xf32>
    %125 = tpu.concatenate %123, %124 in 1 : vector<64x32xf32>, vector<64x32xf32> -> vector<64x64xf32>
    %cst_53 = arith.constant dense<0.000000e+00> : vector<64xf32>
    %126 = vector.multi_reduction <add>, %125, %cst_53 [0] : vector<64x64xf32> to vector<64xf32>
    %127 = vector.shape_cast %126 : vector<64xf32> to vector<1x64xf32>
    %cst_54 = arith.constant 1.562500e-02 : f32
    %128 = vector.broadcast %cst_54 : f32 to vector<1x64xf32>
    %129 = arith.mulf %127, %128 : vector<1x64xf32>
    %130 = vector.extract_strided_slice %129 {offsets = [0, 0], sizes = [1, 32], strides = [1, 1]} : vector<1x64xf32> to vector<1x32xf32>
    %131 = vector.broadcast %130 : vector<1x32xf32> to vector<64x32xf32>
    %132 = arith.subf %123, %131 : vector<64x32xf32>
    %133 = vector.extract_strided_slice %129 {offsets = [0, 32], sizes = [1, 32], strides = [1, 1]} : vector<1x64xf32> to vector<1x32xf32>
    %134 = vector.broadcast %133 : vector<1x32xf32> to vector<64x32xf32>
    %135 = arith.mulf %67, %134 : vector<64x32xf32>
    %136 = arith.subf %132, %135 : vector<64x32xf32>
    %137 = vector.broadcast %73 : vector<1x32xf32> to vector<64x32xf32>
    %138 = arith.mulf %137, %136 : vector<64x32xf32>
    %cst_55 = arith.constant dense<0.000000e+00> : vector<64x32xf32>
    %139 = tpu.matmul %138, %11, %cst_55 {dimension_numbers = #tpu.dot_dimension_numbers<[1], [0], [0], [1], [0, 0, 1, 1], [], []>} : vector<64x32xf32>, vector<32x32xf32>, vector<64x32xf32> -> vector<64x32xf32>
    %140 = arith.mulf %47, %47 : vector<64x32xf32>
    %cst_56 = arith.constant 1.000000e+00 : f32
    %141 = vector.broadcast %cst_56 : f32 to vector<64x32xf32>
    %142 = arith.subf %141, %140 : vector<64x32xf32>
    %143 = arith.mulf %139, %142 : vector<64x32xf32>
    %144 = arith.mulf %143, %42 : vector<64x32xf32>
    %145 = tpu.concatenate %143, %144 in 1 : vector<64x32xf32>, vector<64x32xf32> -> vector<64x64xf32>
    %cst_57 = arith.constant dense<0.000000e+00> : vector<64xf32>
    %146 = vector.multi_reduction <add>, %145, %cst_57 [0] : vector<64x64xf32> to vector<64xf32>
    %147 = vector.shape_cast %146 : vector<64xf32> to vector<1x64xf32>
    %cst_58 = arith.constant 1.562500e-02 : f32
    %148 = vector.broadcast %cst_58 : f32 to vector<1x64xf32>
    %149 = arith.mulf %147, %148 : vector<1x64xf32>
    %150 = vector.extract_strided_slice %149 {offsets = [0, 0], sizes = [1, 32], strides = [1, 1]} : vector<1x64xf32> to vector<1x32xf32>
    %151 = vector.broadcast %150 : vector<1x32xf32> to vector<64x32xf32>
    %152 = arith.subf %143, %151 : vector<64x32xf32>
    %153 = vector.extract_strided_slice %149 {offsets = [0, 32], sizes = [1, 32], strides = [1, 1]} : vector<1x64xf32> to vector<1x32xf32>
    %154 = vector.broadcast %153 : vector<1x32xf32> to vector<64x32xf32>
    %155 = arith.mulf %42, %154 : vector<64x32xf32>
    %156 = arith.subf %152, %155 : vector<64x32xf32>
    %157 = vector.broadcast %48 : vector<1x32xf32> to vector<64x32xf32>
    %158 = arith.mulf %157, %156 : vector<64x32xf32>
    %cst_59 = arith.constant dense<0.000000e+00> : vector<64x32xf32>
    %159 = tpu.matmul %158, %9, %cst_59 {dimension_numbers = #tpu.dot_dimension_numbers<[1], [0], [0], [1], [0, 0, 1, 1], [], []>} : vector<64x32xf32>, vector<32x32xf32>, vector<64x32xf32> -> vector<64x32xf32>
    %c0_60 = arith.constant 0 : index
    %c0_61 = arith.constant 0 : index
    %c0_62 = arith.constant 0 : index
    %160 = vector.load %arg4[%c0_60, %c0_61, %c0_62] : memref<1x64x32xf32, #tpu.memory_space<vmem>>, vector<1x64x32xf32>
    %161 = vector.shape_cast %160 : vector<1x64x32xf32> to vector<64x32xf32>
    %162 = vector.shape_cast %159 : vector<64x32xf32> to vector<1x64x32xf32>
    tpu.vector_store %arg4[%c0_60, %c0_61, %c0_62], %162 {strides = array<i32>} : memref<1x64x32xf32, #tpu.memory_space<vmem>>, vector<1x64x32xf32>,
    return
  }
  func.func @transform_0(%arg0: i32) -> (i32, i32, i32) {
    %c0_i32 = arith.constant 0 : i32
    %c0_i32_0 = arith.constant 0 : i32
    %c0_i32_1 = arith.constant 0 : i32
    return %arg0, %c0_i32, %c0_i32_0 : i32, i32, i32
  }
  func.func @transform_1(%arg0: i32) -> (i32, i32, i32) {
    %c0_i32 = arith.constant 0 : i32
    %c0_i32_0 = arith.constant 0 : i32
    %c0_i32_1 = arith.constant 0 : i32
    %c0_i32_2 = arith.constant 0 : i32
    return %c0_i32, %c0_i32_0, %c0_i32_1 : i32, i32, i32
  }
  func.func @transform_2(%arg0: i32) -> (i32, i32) {
    %c0_i32 = arith.constant 0 : i32
    %c0_i32_0 = arith.constant 0 : i32
    %c0_i32_1 = arith.constant 0 : i32
    return %c0_i32, %c0_i32_0 : i32, i32
  }
  func.func @transform_3(%arg0: i32) -> (i32, i32, i32) {
    %c0_i32 = arith.constant 0 : i32
    %c0_i32_0 = arith.constant 0 : i32
    %c0_i32_1 = arith.constant 0 : i32
    return %arg0, %c0_i32, %c0_i32_0 : i32, i32, i32
  }
}

</mosaic_0001>

<bundles_post_ra>
// kernel: divergence_free_net_steps.1
= control target key start
LH: loop header
LB: loop body
LE: loop exit
PB: predicated region body
PF: predicated region fallthrough
CT: control target
= control target key end

     0   :  { %s2208_s12 = smov 0   ;;  %s2884_s0 = inlined_call_operand.vmem [shape: f32[8,64,32], index: 0, kind: input, shape index: {}]   ;;  %s2885_s1 = inlined_call_operand.vmem [shape: f32[6,32,32], index: 1, kind: input, shape index: {}]   ;;  %s2886_s2 = inlined_call_operand.vmem [shape: f32[10,32], index: 2, kind: input, shape index: {}]   ;;  %s2887_s3 = inlined_call_operand.vmem [shape: f32[8,64,32], index: 3, kind: output, shape index: {}]  }
   0x1 LB: > { %s1784_s13 = sadd.s32 4294967295, %s2184_s12   ;;  %p1788_p0 = scmp.ge.s32.totalorder %s2184_s12, 1  ;;  %s2184_s12 = sphi %s2208_s12, %s13_s12  }
   0x2   : > { %p137_p1 = scmp.lt.s32.totalorder %s2184_s12, 9 }
   0x4   : > { %p138_p2 = pnand %p1788_p0, %p137_p1 }
   0x6   : > { %141 = sbr.rel (%p138_p2) target bundleno = 2433 (0x981), region = 32 }
   0xd   : > { %v179_v0 = vld [vmem:[%s2885_s1] sm:$0xff]  ;;  %v180_v1 = vld [vmem:[%s2885_s1 + $0x8] sm:$0xff]  ;;  %v181_v2 = vld [vmem:[%s2885_s1 + $0x10] sm:$0xff]  ;;  %p161_p3 = scmp.lt.s32.totalorder %s1784_s13, 7  ;;  %vm222_vm0 = vcmask 261120   ;;  %s2186_s11 = smov 32  }
   0xe   : > { %v2064_v3 = vpack.c.bf16 %v180_v1, %v179_v0  ;;  %v182_v4 = vld [vmem:[%s2885_s1 + $0x18] sm:$0xff]  ;;  %v1793_v14 = vld [vmem:[%s2885_s1 + $0x20] sm:$0xff]  ;;  %v1794_v15 = vld [vmem:[%s2885_s1 + $0x28] sm:$0xff]  ;;  %vm1003_vm1 = vcmask 523264   ;;  %s2187_s23 = smov 96  }
   0xf   : > { %v2068_v5 = vpack.c.bf16 %v182_v4, %v181_v2  ;;  %s2922_s13 = smov (!%p161_p3, %s1784_s13), 7  ;;  %v1795_v16 = vld [vmem:[%s2885_s1 + $0x30] sm:$0xff]  ;;  %v2072_v17 = vpack.c.bf16 %v1794_v15, %v1793_v14  ;;  %v1796_v18 = vld [vmem:[%s2885_s1 + $0x38] sm:$0xff]  ;;  %v1813_v20 = vld [vmem:[%s2886_s2] ss:$0 sm:$0xff] }
  0x10   : > { %2065 = vmatprep.subr.bf16.mxu0 %v2064_v3  ;;  %s1870_s22 = sshll.u32 %s2922_s13, 6  ;;  %v2076_v19 = vpack.c.bf16 %v1796_v18, %v1795_v16 }
  0x11   : > { %2067 = vmatpush3.bf16.msra.mxu0 %v2064_v3  ;;  %s165_s25 = scalar_lea.vmem %s2884_s0, %s1870_s22  ;;  %2073 = vmatprep.subr.bf16.mxu1 %v2072_v17  ;;  %s170_s19 = scalar_lea.vmem %s2887_s3, %s1870_s22 }
  0x12   : > { %2069 = vmatprep.subr.bf16.mxu0 %v2068_v5  ;;  %v171_v6 = vld [vmem:[%s165_s25] sm:$0xff]  ;;  %v172_v7 = vld [vmem:[%s165_s25 + $0x8] sm:$0xff]  ;;  %v173_v8 = vld [vmem:[%s165_s25 + $0x10] sm:$0xff]  ;;  %2075 = vmatpush3.bf16.msra.mxu1 %v2072_v17 }
  0x13   : > { %1952 = vmatprep.mubr.msk.f32.mxu0 %vm222_vm0, %v171_v6  ;;  %v174_v9 = vld [vmem:[%s165_s25 + $0x18] sm:$0xff]  ;;  %v175_v10 = vld [vmem:[%s165_s25 + $0x20] sm:$0xff]  ;;  %v176_v11 = vld [vmem:[%s165_s25 + $0x28] sm:$0xff]  ;;  %2077 = vmatprep.subr.bf16.mxu1 %v2076_v19 }
  0x14   : > { %v177_v12 = vld [vmem:[%s165_s25 + $0x30] sm:$0xff]  ;;  %v178_v13 = vld [vmem:[%s165_s25 + $0x38] sm:$0xff] }
  0x15   : > { %2071 = vmatpush3.bf16.msra.mxu0 %v2068_v5 }
  0x16   : > { %2079 = vmatpush3.bf16.msra.mxu1 %v2076_v19 }
  0x18   : > { %1953 = vmatmul.mubr.msk.f32.vlgmr.msra.gmra.mrb[0].mxu0 %vm222_vm0, %v172_v7 }
  0x19   : > { %1955 = vmatprep.mubr.msk.f32.mxu0 %vm222_vm0, %v173_v8 }
  0x1c   : > { %1956 = vmatmul.mubr.msk.f32.gmra.mrb[2].mxu0 %vm222_vm0, %v174_v9 }
  0x1d   : > { %1958 = vmatprep.mubr.msk.f32.mxu0 %vm222_vm0, %v175_v10 }
  0x20   : > { %1959 = vmatmul.mubr.msk.f32.gmra.mrb[4].mxu0 %vm222_vm0, %v176_v11 }
  0x21   : > { %1961 = vmatprep.mubr.msk.f32.mxu0 %vm222_vm0, %v177_v12 }
  0x24   : > { %1962 = vmatmul.mubr.msk.f32.gmra.mrb[6].mxu0 %vm222_vm0, %v178_v13 }
  0xeb   : > { %v1954_v21 = vpop.f32.mrb[0].mxu0 }
  0xec   : > { %v319_v22 = vadd.f32 %v1954_v21, %v1813_v20  ;;  %v313_v23 = vpop.f32.mrb[1].mxu0 }
  0xed   : > { %v314_v24 = vadd.f32 %v1813_v20, %v313_v23 }
  0xee   : > { %v353_v25 = vsel %vm222_vm0, %v319_v22, 0.0 }
  0xef   : > { %v352_v26 = vsel %vm222_vm0, %v314_v24, 0.0  ;;  %v1957_v27 = vpop.f32.mrb[2].mxu0 }
  0xf0   : > { %v354_v28 = vadd.f32 %v353_v25, %v352_v26  ;;  %v323_v29 = vpop.f32.mrb[3].mxu0  ;;  %v329_v30 = vadd.f32 %v1957_v27, %v1813_v20 }
  0xf1   : > { %v324_v31 = vadd.f32 %v1813_v20, %v323_v29 }
  0xf2   : > { %v357_v36 = vsel %vm222_vm0, %v329_v30, 0.0 }
  0xf3   : > { %v355_v32 = vsel %vm222_vm0, %v324_v31, 0.0  ;;  %v1960_v33 = vpop.f32.mrb[4].mxu0 }
  0xf4   : > { %v356_v34 = vadd.f32 %v355_v32, %v354_v28  ;;  %v333_v35 = vpop.f32.mrb[5].mxu0  ;;  %v339_v37 = vadd.f32 %v1960_v33, %v1813_v20 }
  0xf5   : > { %v334_v38 = vadd.f32 %v1813_v20, %v333_v35 }
  0xf6   : > { %v358_v39 = vadd.f32 %v357_v36, %v356_v34  ;;  %v361_v44 = vsel %vm222_vm0, %v339_v37, 0.0  ;;  %v422_v34 = vlaneseq }
  0xf7   : > { %v359_v40 = vsel %vm222_vm0, %v334_v38, 0.0  ;;  %v1963_v41 = vpop.f32.mrb[6].mxu0 }
  0xf8   : > { %v360_v42 = vadd.f32 %v359_v40, %v358_v39  ;;  %v343_v43 = vpop.f32.mrb[7].mxu0  ;;  %v349_v45 = vadd.f32 %v1963_v41, %v1813_v20  ;;  %v423_v35 = vshrl.u32 %v422_v34, 7 }
  0xf9   : > { %v344_v46 = vadd.f32 %v1813_v20, %v343_v43 }
  0xfa   : > { %v362_v47 = vadd.f32 %v361_v44, %v360_v42  ;;  %v365_v50 = vsel %vm222_vm0, %v349_v45, 0.0  ;;  %v2275_v36 = vsub.s32 0, %v423_v35 }
  0xfb   : > { %v363_v48 = vsel %vm222_vm0, %v344_v46, 0.0 }
  0xfc   : > { %v364_v49 = vadd.f32 %v363_v48, %v362_v47  ;;  %v1822_v48 = vld [vmem:[%s2886_s2 + $0x2] ss:$0 sm:$0xff] }
  0xfe   : > { %v366_v51 = vadd.f32 %v365_v50, %v364_v49 }
 0x100   : > { %v367_v52 = vrot.slane %v366_v51, 4 }
 0x102   : > { %v368_v53 = vadd.f32 %v367_v52, %v366_v51 }
 0x104   : > { %v369_v54 = vrot.slane %v368_v53, 2 }
 0x106   : > { %v370_v55 = vadd.f32 %v369_v54, %v368_v53 }
 0x108   : > { %v371_v56 = vrot.slane %v370_v55, 1 }
 0x10a   : > { %v372_v57 = vadd.f32 %v371_v56, %v370_v55 }
 0x10c   : > { %v373_v58 = vmul.f32 0.015625, %v372_v57 }
 0x10e   : > { %v374_v59 = vsub.f32 %v314_v24, %v373_v58  ;;  %v375_v60 = vsub.f32 %v319_v22, %v373_v58  ;;  %v376_v61 = vsub.f32 %v324_v31, %v373_v58  ;;  %v377_v62 = vsub.f32 %v329_v30, %v373_v58 }
 0x10f   : > { %v378_v63 = vsub.f32 %v334_v38, %v373_v58  ;;  %v379_v0 = vsub.f32 %v339_v37, %v373_v58  ;;  %v380_v1 = vsub.f32 %v344_v46, %v373_v58  ;;  %v381_v2 = vsub.f32 %v349_v45, %v373_v58  ;;  %v2177_v37 = vld [vmem:[%s2886_s2 + $0x1] ss:$0 sm:$0xff] }
 0x110   : > { %v382_v3 = vmul.f32 %v374_v59, %v374_v59  ;;  %v383_v4 = vmul.f32 %v375_v60, %v375_v60  ;;  %v384_v5 = vmul.f32 %v376_v61, %v376_v61  ;;  %v385_v6 = vmul.f32 %v377_v62, %v377_v62 }
 0x111   : > { %v386_v10 = vmul.f32 %v378_v63, %v378_v63  ;;  %v387_v13 = vmul.f32 %v379_v0, %v379_v0  ;;  %v388_v16 = vmul.f32 %v380_v1, %v380_v1  ;;  %v389_v19 = vmul.f32 %v381_v2, %v381_v2 }
 0x112   : > { %v390_v7 = vsel %vm222_vm0, %v382_v3, 0.0  ;;  %v391_v8 = vsel %vm222_vm0, %v383_v4, 0.0  ;;  %v393_v11 = vsel %vm222_vm0, %v384_v5, 0.0  ;;  %v395_v14 = vsel %vm222_vm0, %v385_v6, 0.0 }
 0x113   : > { %v392_v9 = vadd.f32 %v391_v8, %v390_v7  ;;  %v397_v17 = vsel %vm222_vm0, %v386_v10, 0.0  ;;  %v399_v20 = vsel %vm222_vm0, %v387_v13, 0.0  ;;  %v401_v22 = vsel %vm222_vm0, %v388_v16, 0.0  ;;  %v1797_v8 = vld [vmem:[%s2885_s1 + $0x40] sm:$0xff]  ;;  %v1799_v10 = vld [vmem:[%s2885_s1 + $0x50] sm:$0xff] }
 0x114   : > { %v403_v24 = vsel %vm222_vm0, %v389_v19, 0.0 }
 0x115   : > { %v394_v12 = vadd.f32 %v393_v11, %v392_v9  ;;  %v1798_v9 = vld [vmem:[%s2885_s1 + $0x48] sm:$0xff] }
 0x116   : > { %v2080_v11 = vpack.c.bf16 %v1798_v9, %v1797_v8 }
 0x117   : > { %v396_v15 = vadd.f32 %v395_v14, %v394_v12  ;;  %v1800_v12 = vld [vmem:[%s2885_s1 + $0x58] sm:$0xff]  ;;  %v1823_v14 = vld [vmem:[%s2886_s2 + $0x3] ss:$0 sm:$0xff] }
 0x118   : > { %v2084_v13 = vpack.c.bf16 %v1800_v12, %v1799_v10  ;;  %2081 = vmatprep.subr.bf16.mxu0 %v2080_v11 }
 0x119   : > { %v398_v18 = vadd.f32 %v397_v17, %v396_v15  ;;  %2083 = vmatpush3.bf16.msra.mxu0 %v2080_v11 }
 0x11a   : > { %2085 = vmatprep.subr.bf16.mxu0 %v2084_v13 }
 0x11b   : > { %v400_v21 = vadd.f32 %v399_v20, %v398_v18 }
 0x11d   : > { %v402_v23 = vadd.f32 %v401_v22, %v400_v21  ;;  %2087 = vmatpush3.bf16.msra.mxu0 %v2084_v13 }
 0x11f   : > { %v404_v25 = vadd.f32 %v403_v24, %v402_v23 }
 0x121   : > { %v405_v26 = vrot.slane %v404_v25, 4 }
 0x123   : > { %v406_v27 = vadd.f32 %v405_v26, %v404_v25 }
 0x125   : > { %v407_v28 = vrot.slane %v406_v27, 2 }
 0x127   : > { %v408_v29 = vadd.f32 %v407_v28, %v406_v27 }
 0x129   : > { %v409_v30 = vrot.slane %v408_v29, 1 }
 0x12b   : > { %v410_v31 = vadd.f32 %v409_v30, %v408_v29 }
 0x12d   : > { %v411_v32 = vmul.f32 0.015625, %v410_v31 }
 0x12f   : > { %v412_v33 = vadd.f32 1e-05, %v411_v32 }
 0x131   : > { %2122 = vrsqrt.f32 %v412_v33 }
 0x13b   : > { %v2280_v38 = vpop.eup %2122 }
 0x13c   : > { %2903 = vst [vmem:[#allocation2_spill] sm:$0xff] %v2280_v38  ;;  %v2283_v39 = vmul.f32 %v2280_v38, %v375_v60  ;;  %v2286_v40 = vmul.f32 %v2280_v38, %v376_v61  ;;  %v2289_v41 = vmul.f32 %v2280_v38, %v377_v62  ;;  %v2292_v42 = vmul.f32 %v2280_v38, %v378_v63 }
 0x13d   : > { %v2295_v43 = vmul.f32 %v2280_v38, %v379_v0  ;;  %v2298_v44 = vmul.f32 %v2280_v38, %v380_v1  ;;  %v2301_v45 = vmul.f32 %v2280_v38, %v381_v2  ;;  %v2304_v46 = vmul.f32 %v2280_v38, %v374_v59 }
 0x13e   : > { %2904 = vst [vmem:[#allocation3_spill] sm:$0xff] %v2286_v40  ;;  %2905 = vst [vmem:[#allocation4_spill] sm:$0xff] %v2289_v41  ;;  %v427_v47 = vmul.f32 %v2177_v37, %v2283_v39  ;;  %v428_v50 = vmul.f32 %v2177_v37, %v2286_v40  ;;  %v429_v53 = vmul.f32 %v2177_v37, %v2289_v41 }
 0x13f   : > { %2906 = vst [vmem:[#allocation5_spill] sm:$0xff] %v2292_v42  ;;  %2907 = vst [vmem:[#allocation6_spill] sm:$0xff] %v2295_v43  ;;  %v426_v49 = vmul.f32 %v2177_v37, %v2304_v46  ;;  %v430_v54 = vmul.f32 %v2177_v37, %v2292_v42  ;;  %v431_v56 = vmul.f32 %v2177_v37, %v2295_v43 }
 0x140   : > { %2908 = vst [vmem:[#allocation7_spill] sm:$0xff] %v2298_v44  ;;  %2909 = vst [vmem:[#allocation8_spill] sm:$0xff] %v2301_v45  ;;  %v439_v51 = vadd.f32 %v1822_v48, %v427_v47  ;;  %v440_v55 = vadd.f32 %v1822_v48, %v428_v50  ;;  %v441_v57 = vadd.f32 %v1822_v48, %v429_v53 }
 0x141   : > { %v438_v52 = vadd.f32 %v1822_v48, %v426_v49  ;;  %v432_v58 = vmul.f32 %v2177_v37, %v2298_v44  ;;  %v442_v59 = vadd.f32 %v1822_v48, %v430_v54  ;;  %v433_v60 = vmul.f32 %v2177_v37, %v2301_v45 }
 0x142   : > { %2124 = vtanh.f32 %v439_v51  ;;  %v443_v61 = vadd.f32 %v1822_v48, %v431_v56 }
 0x143   : > { %2126 = vtanh.f32 %v438_v52  ;;  %v444_v62 = vadd.f32 %v1822_v48, %v432_v58  ;;  %v445_v0 = vadd.f32 %v1822_v48, %v433_v60 }
 0x144   : > { %2128 = vtanh.f32 %v440_v55 }
 0x145   : > { %2130 = vtanh.f32 %v441_v57 }
 0x146   : > { %2132 = vtanh.f32 %v442_v59 }
 0x147   : > { %2134 = vtanh.f32 %v443_v61 }
 0x148   : > { %2136 = vtanh.f32 %v444_v62 }
 0x149   : > { %2138 = vtanh.f32 %v445_v0 }
 0x14c   : > { %v2317_v63 = vpop.eup %2124 }
 0x14d   : > { %v2319_v1 = vpop.eup %2126 }
 0x14e   : > { %1972 = vmatprep.mubr.msk.f32.mxu1 %vm222_vm0, %v2319_v1  ;;  %v2323_v2 = vpop.eup %2128 }
 0x14f   : > { %1973 = vmatmul.mubr.msk.f32.vlgmr.msra.gmra.mrb[0].mxu1 %vm222_vm0, %v2317_v63  ;;  %v2329_v3 = vpop.eup %2130 }
 0x150   : > { %1975 = vmatprep.mubr.msk.f32.mxu1 %vm222_vm0, %v2323_v2  ;;  %v2331_v4 = vpop.eup %2132 }
 0x151   : > { %v2337_v5 = vpop.eup %2134 }
 0x152   : > { %v2339_v6 = vpop.eup %2136 }
 0x153   : > { %1976 = vmatmul.mubr.msk.f32.gmra.mrb[2].mxu1 %vm222_vm0, %v2329_v3  ;;  %2910 = vst [vmem:[#allocation9_spill] sm:$0xff] %v2339_v6  ;;  %v2345_v7 = vpop.eup %2138 }
 0x154   : > { %1978 = vmatprep.mubr.msk.f32.mxu1 %vm222_vm0, %v2331_v4  ;;  %2911 = vst [vmem:[#allocation10_spill] sm:$0xff] %v2345_v7 }
 0x157   : > { %1979 = vmatmul.mubr.msk.f32.gmra.mrb[4].mxu1 %vm222_vm0, %v2337_v5 }
 0x158   : > { %1981 = vmatprep.mubr.msk.f32.mxu1 %vm222_vm0, %v2339_v6 }
 0x15b   : > { %1982 = vmatmul.mubr.msk.f32.gmra.mrb[6].mxu1 %vm222_vm0, %v2345_v7 }
 0x222   : > { %v1974_v15 = vpop.f32.mrb[0].mxu1 }
 0x223   : > { %v555_v16 = vadd.f32 %v1974_v15, %v1823_v14  ;;  %v549_v17 = vpop.f32.mrb[1].mxu1 }
 0x224   : > { %v550_v18 = vadd.f32 %v1823_v14, %v549_v17 }
 0x225   : > { %v589_v19 = vsel %vm222_vm0, %v555_v16, 0.0 }
 0x226   : > { %v588_v20 = vsel %vm222_vm0, %v550_v18, 0.0  ;;  %v1977_v21 = vpop.f32.mrb[2].mxu1 }
 0x227   : > { %v590_v22 = vadd.f32 %v589_v19, %v588_v20  ;;  %v559_v23 = vpop.f32.mrb[3].mxu1  ;;  %v565_v24 = vadd.f32 %v1977_v21, %v1823_v14 }
 0x228   : > { %v560_v25 = vadd.f32 %v1823_v14, %v559_v23 }
 0x229   : > { %v593_v30 = vsel %vm222_vm0, %v565_v24, 0.0 }
 0x22a   : > { %v591_v26 = vsel %vm222_vm0, %v560_v25, 0.0  ;;  %v1980_v27 = vpop.f32.mrb[4].mxu1 }
 0x22b   : > { %v592_v28 = vadd.f32 %v591_v26, %v590_v22  ;;  %v569_v29 = vpop.f32.mrb[5].mxu1  ;;  %v575_v31 = vadd.f32 %v1980_v27, %v1823_v14 }
 0x22c   : > { %v570_v32 = vadd.f32 %v1823_v14, %v569_v29 }
 0x22d   : > { %v594_v33 = vadd.f32 %v593_v30, %v592_v28  ;;  %v597_v48 = vsel %vm222_vm0, %v575_v31, 0.0 }
 0x22e   : > { %v595_v34 = vsel %vm222_vm0, %v570_v32, 0.0  ;;  %v1983_v35 = vpop.f32.mrb[6].mxu1 }
 0x22f   : > { %v596_v37 = vadd.f32 %v595_v34, %v594_v33  ;;  %v579_v47 = vpop.f32.mrb[7].mxu1  ;;  %v585_v49 = vadd.f32 %v1983_v35, %v1823_v14 }
 0x230   : > { %v580_v50 = vadd.f32 %v1823_v14, %v579_v47 }
 0x231   : > { %v598_v51 = vadd.f32 %v597_v48, %v596_v37  ;;  %v601_v54 = vsel %vm222_vm0, %v585_v49, 0.0 }
 0x232   : > { %v599_v52 = vsel %vm222_vm0, %v580_v50, 0.0 }
 0x233   : > { %v600_v53 = vadd.f32 %v599_v52, %v598_v51 }
 0x235   : > { %v602_v55 = vadd.f32 %v601_v54, %v600_v53 }
 0x237   : > { %v603_v56 = vrot.slane %v602_v55, 4 }
 0x239   : > { %v604_v57 = vadd.f32 %v603_v56, %v602_v55  ;;  %v2383_v56 = vld [vmem:[%s2886_s2 + $0x4] sm:$0x1] }
 0x23b   : > { %v605_v58 = vrot.slane %v604_v57, 2 }
 0x23d   : > { %v606_v59 = vadd.f32 %v605_v58, %v604_v57  ;;  %v661_v57 = vrot.slane %v2383_v56, %v2275_v36 }
 0x23f   : > { %v607_v60 = vrot.slane %v606_v59, 1 }
 0x241   : > { %v608_v61 = vadd.f32 %v607_v60, %v606_v59 }
 0x243   : > { %v609_v62 = vmul.f32 0.015625, %v608_v61 }
 0x245   : > { %v610_v0 = vsub.f32 %v550_v18, %v609_v62  ;;  %v611_v8 = vsub.f32 %v555_v16, %v609_v62  ;;  %v612_v9 = vsub.f32 %v560_v25, %v609_v62  ;;  %v613_v10 = vsub.f32 %v565_v24, %v609_v62 }
 0x246   : > { %v614_v11 = vsub.f32 %v570_v32, %v609_v62  ;;  %v615_v12 = vsub.f32 %v575_v31, %v609_v62  ;;  %v616_v13 = vsub.f32 %v580_v50, %v609_v62  ;;  %v617_v14 = vsub.f32 %v585_v49, %v609_v62 }
 0x247   : > { %v618_v15 = vmul.f32 %v610_v0, %v610_v0  ;;  %v619_v17 = vmul.f32 %v611_v8, %v611_v8  ;;  %v620_v19 = vmul.f32 %v612_v9, %v612_v9  ;;  %v621_v20 = vmul.f32 %v613_v10, %v613_v10 }
 0x248   : > { %v622_v26 = vmul.f32 %v614_v11, %v614_v11  ;;  %v623_v16 = vmul.f32 %v615_v12, %v615_v12  ;;  %v624_v28 = vmul.f32 %v616_v13, %v616_v13  ;;  %v625_v31 = vmul.f32 %v617_v14, %v617_v14 }
 0x249   : > { %v626_v21 = vsel %vm222_vm0, %v618_v15, 0.0  ;;  %v627_v22 = vsel %vm222_vm0, %v619_v17, 0.0  ;;  %v629_v27 = vsel %vm222_vm0, %v620_v19, 0.0  ;;  %v631_v24 = vsel %vm222_vm0, %v621_v20, 0.0  ;;  %v1832_v15 = vld [vmem:[%s2886_s2 + $0x5] ss:$0 sm:$0xff] }
 0x24a   : > { %v628_v23 = vadd.f32 %v627_v22, %v626_v21  ;;  %v633_v29 = vsel %vm222_vm0, %v622_v26, 0.0  ;;  %v635_v32 = vsel %vm222_vm0, %v623_v16, 0.0  ;;  %v637_v34 = vsel %vm222_vm0, %v624_v28, 0.0 }
 0x24b   : > { %v639_v37 = vsel %vm222_vm0, %v625_v31, 0.0 }
 0x24c   : > { %v630_v18 = vadd.f32 %v629_v27, %v628_v23 }
 0x24e   : > { %v632_v25 = vadd.f32 %v631_v24, %v630_v18 }
 0x250   : > { %v634_v30 = vadd.f32 %v633_v29, %v632_v25 }
 0x252   : > { %v636_v33 = vadd.f32 %v635_v32, %v634_v30 }
 0x254   : > { %v638_v35 = vadd.f32 %v637_v34, %v636_v33 }
 0x256   : > { %v640_v47 = vadd.f32 %v639_v37, %v638_v35  ;;  %v1833_v37 = vld [vmem:[%s2886_s2 + $0x6] ss:$0 sm:$0xff] }
 0x258   : > { %v641_v48 = vrot.slane %v640_v47, 4 }
 0x25a   : > { %v642_v49 = vadd.f32 %v641_v48, %v640_v47 }
 0x25c   : > { %v643_v50 = vrot.slane %v642_v49, 2 }
 0x25e   : > { %v644_v51 = vadd.f32 %v643_v50, %v642_v49 }
 0x260   : > { %v645_v52 = vrot.slane %v644_v51, 1 }
 0x262   : > { %v646_v53 = vadd.f32 %v645_v52, %v644_v51 }
 0x264   : > { %v647_v54 = vmul.f32 0.015625, %v646_v53 }
 0x266   : > { %v648_v55 = vadd.f32 1e-05, %v647_v54 }
 0x268   : > { %2140 = vrsqrt.f32 %v648_v55 }
 0x272   : > { %v2387_v58 = vpop.eup %2140 }
 0x273   : > { %v2390_v59 = vmul.f32 %v2387_v58, %v610_v0  ;;  %v2393_v60 = vmul.f32 %v2387_v58, %v611_v8  ;;  %v2396_v61 = vmul.f32 %v2387_v58, %v612_v9  ;;  %v2399_v62 = vmul.f32 %v2387_v58, %v613_v10 }
 0x274   : > { %v2405_v17 = vmul.f32 %v2387_v58, %v614_v11  ;;  %v2408_v19 = vmul.f32 %v2387_v58, %v615_v12  ;;  %v2411_v0 = vmul.f32 %v2387_v58, %v616_v13  ;;  %v2414_v8 = vmul.f32 %v2387_v58, %v617_v14 }
 0x275   : > { %v662_v9 = vmul.f32 %v661_v57, %v2390_v59  ;;  %v663_v10 = vmul.f32 %v661_v57, %v2393_v60  ;;  %v664_v20 = vmul.f32 %v661_v57, %v2396_v61  ;;  %v665_v21 = vmul.f32 %v661_v57, %v2399_v62 }
 0x276   : > { %v666_v11 = vmul.f32 %v661_v57, %v2405_v17  ;;  %v667_v13 = vmul.f32 %v661_v57, %v2408_v19  ;;  %v668_v14 = vmul.f32 %v661_v57, %v2411_v0  ;;  %v669_v18 = vmul.f32 %v661_v57, %v2414_v8 }
 0x277   : > { %v674_v22 = vadd.f32 %v1832_v15, %v662_v9  ;;  %v675_v23 = vadd.f32 %v1832_v15, %v663_v10  ;;  %v676_v12 = vadd.f32 %v1832_v15, %v664_v20  ;;  %v677_v26 = vadd.f32 %v1832_v15, %v665_v21 }
 0x278   : > { %v678_v27 = vadd.f32 %v1832_v15, %v666_v11  ;;  %v679_v16 = vadd.f32 %v1832_v15, %v667_v13  ;;  %v680_v24 = vadd.f32 %v1832_v15, %v668_v14  ;;  %v681_v25 = vadd.f32 %v1832_v15, %v669_v18 }
 0x279   : > { %2142 = vtanh.f32 %v674_v22 }
 0x27a   : > { %2144 = vtanh.f32 %v675_v23 }
 0x27b   : > { %2146 = vtanh.f32 %v676_v12 }
 0x27c   : > { %2148 = vtanh.f32 %v677_v26 }
 0x27d   : > { %2150 = vtanh.f32 %v678_v27 }
 0x27e   : > { %2152 = vtanh.f32 %v679_v16 }
 0x27f   : > { %2154 = vtanh.f32 %v680_v24 }
 0x280   : > { %2156 = vtanh.f32 %v681_v25 }
 0x283   : > { %v2424_v28 = vpop.eup %2142 }
 0x284   : > { %v2426_v29 = vpop.eup %2144  ;;  %1992 = vmatprep.mubr.msk.f32.mxu0 %vm222_vm0, %v2424_v28 }
 0x285   : > { %v2430_v30 = vpop.eup %2146  ;;  %1993 = vmatmul.mubr.msk.f32.vlgmr.msra.gmra.mrb[8].mxu0 %vm222_vm0, %v2426_v29 }
 0x286   : > { %1995 = vmatprep.mubr.msk.f32.mxu0 %vm222_vm0, %v2430_v30  ;;  %v2436_v31 = vpop.eup %2148 }
 0x287   : > { %v2438_v32 = vpop.eup %2150 }
 0x288   : > { %v2444_v33 = vpop.eup %2152 }
 0x289   : > { %1996 = vmatmul.mubr.msk.f32.gmra.mrb[10].mxu0 %vm222_vm0, %v2436_v31  ;;  %v2446_v34 = vpop.eup %2154 }
 0x28a   : > { %1998 = vmatprep.mubr.msk.f32.mxu0 %vm222_vm0, %v2438_v32  ;;  %v2452_v35 = vpop.eup %2156 }
 0x28d   : > { %1999 = vmatmul.mubr.msk.f32.gmra.mrb[12].mxu0 %vm222_vm0, %v2444_v33 }
 0x28e   : > { %2001 = vmatprep.mubr.msk.f32.mxu0 %vm222_vm0, %v2446_v34 }
 0x291   : > { %2002 = vmatmul.mubr.msk.f32.gmra.mrb[14].mxu0 %vm222_vm0, %v2452_v35 }
 0x358   : > { %v1994_v47 = vpop.f32.mrb[8].mxu0 }
 0x359   : > { %v791_v48 = vadd.f32 %v1994_v47, %v1833_v37  ;;  %v785_v49 = vpop.f32.mrb[9].mxu0 }
 0x35a   : > { %v786_v50 = vadd.f32 %v1833_v37, %v785_v49 }
 0x35b   : > { %v825_v51 = vsel %vm222_vm0, %v791_v48, 0.0 }
 0x35c   : > { %v824_v52 = vsel %vm222_vm0, %v786_v50, 0.0  ;;  %v1997_v53 = vpop.f32.mrb[10].mxu0 }
 0x35d   : > { %v826_v54 = vadd.f32 %v825_v51, %v824_v52  ;;  %v795_v55 = vpop.f32.mrb[11].mxu0  ;;  %v801_v57 = vadd.f32 %v1997_v53, %v1833_v37 }
 0x35e   : > { %v796_v15 = vadd.f32 %v1833_v37, %v795_v55 }
 0x35f   : > { %v829_v11 = vsel %vm222_vm0, %v801_v57, 0.0 }
 0x360   : > { %v827_v9 = vsel %vm222_vm0, %v796_v15, 0.0  ;;  %v2000_v10 = vpop.f32.mrb[12].mxu0 }
 0x361   : > { %v828_v20 = vadd.f32 %v827_v9, %v826_v54  ;;  %v805_v21 = vpop.f32.mrb[13].mxu0  ;;  %v811_v22 = vadd.f32 %v2000_v10, %v1833_v37 }
 0x362   : > { %v806_v23 = vadd.f32 %v1833_v37, %v805_v21 }
 0x363   : > { %v830_v12 = vadd.f32 %v829_v11, %v828_v20  ;;  %v833_v18 = vsel %vm222_vm0, %v811_v22, 0.0 }
 0x364   : > { %v831_v13 = vsel %vm222_vm0, %v806_v23, 0.0  ;;  %v2003_v26 = vpop.f32.mrb[14].mxu0 }
 0x365   : > { %v832_v14 = vadd.f32 %v831_v13, %v830_v12  ;;  %v815_v27 = vpop.f32.mrb[15].mxu0  ;;  %v821_v16 = vadd.f32 %v2003_v26, %v1833_v37 }
 0x366   : > { %v816_v24 = vadd.f32 %v1833_v37, %v815_v27 }
 0x367   : > { %v834_v25 = vadd.f32 %v833_v18, %v832_v14  ;;  %v837_v51 = vsel %vm222_vm0, %v821_v16, 0.0 }
 0x368   : > { %v835_v47 = vsel %vm222_vm0, %v816_v24, 0.0 }
 0x369   : > { %v836_v49 = vadd.f32 %v835_v47, %v834_v25 }
 0x36b   : > { %v838_v52 = vadd.f32 %v837_v51, %v836_v49 }
 0x36d   : > { %v839_v53 = vrot.slane %v838_v52, 4 }
 0x36f   : > { %v840_v54 = vadd.f32 %v839_v53, %v838_v52 }
 0x371   : > { %v841_v55 = vrot.slane %v840_v54, 2 }
 0x373   : > { %v842_v9 = vadd.f32 %v841_v55, %v840_v54 }
 0x375   : > { %v843_v10 = vrot.slane %v842_v9, 1 }
 0x377   : > { %v844_v20 = vadd.f32 %v843_v10, %v842_v9 }
 0x379   : > { %v845_v21 = vmul.f32 0.015625, %v844_v20 }
 0x37b   : > { %v846_v11 = vsub.f32 %v786_v50, %v845_v21  ;;  %v847_v12 = vsub.f32 %v791_v48, %v845_v21  ;;  %v848_v13 = vsub.f32 %v796_v15, %v845_v21  ;;  %v849_v38 = vsub.f32 %v801_v57, %v845_v21 }
 0x37c   : > { %v850_v26 = vsub.f32 %v806_v23, %v845_v21  ;;  %v851_v37 = vsub.f32 %v811_v22, %v845_v21  ;;  %v852_v14 = vsub.f32 %v816_v24, %v845_v21  ;;  %v853_v27 = vsub.f32 %v821_v16, %v845_v21 }
 0x37d   : > { %v854_v18 = vmul.f32 %v846_v11, %v846_v11  ;;  %v855_v25 = vmul.f32 %v847_v12, %v847_v12  ;;  %v856_v47 = vmul.f32 %v848_v13, %v848_v13  ;;  %v857_v44 = vmul.f32 %v849_v38, %v849_v38 }
 0x37e   : > { %v858_v53 = vmul.f32 %v850_v26, %v850_v26  ;;  %v859_v48 = vmul.f32 %v851_v37, %v851_v37  ;;  %v860_v22 = vmul.f32 %v852_v14, %v852_v14  ;;  %v861_v24 = vmul.f32 %v853_v27, %v853_v27 }
 0x37f   : > { %v862_v49 = vsel %vm222_vm0, %v854_v18, 0.0  ;;  %v863_v51 = vsel %vm222_vm0, %v855_v25, 0.0  ;;  %v865_v54 = vsel %vm222_vm0, %v856_v47, 0.0  ;;  %v867_v57 = vsel %vm222_vm0, %v857_v44, 0.0 }
 0x380   : > { %v864_v52 = vadd.f32 %v863_v51, %v862_v49  ;;  %v869_v23 = vsel %vm222_vm0, %v858_v53, 0.0  ;;  %v871_v55 = vsel %vm222_vm0, %v859_v48, 0.0  ;;  %v873_v10 = vsel %vm222_vm0, %v860_v22, 0.0  ;;  %v2478_v53 = vld [vmem:[%s2886_s2 + $0x7] sm:$0x1] }
 0x381   : > { %v875_v21 = vsel %vm222_vm0, %v861_v24, 0.0  ;;  %v897_v48 = vrot.slane %v2478_v53, %v2275_v36  ;;  %v1842_v24 = vld [vmem:[%s2886_s2 + $0x8] ss:$0 sm:$0xff] }
 0x382   : > { %v866_v50 = vadd.f32 %v865_v54, %v864_v52 }
 0x384   : > { %v868_v15 = vadd.f32 %v867_v57, %v866_v50 }
 0x386   : > { %v870_v16 = vadd.f32 %v869_v23, %v868_v15 }
 0x388   : > { %v872_v9 = vadd.f32 %v871_v55, %v870_v16 }
 0x38a   : > { %v874_v20 = vadd.f32 %v873_v10, %v872_v9 }
 0x38c   : > { %v876_v18 = vadd.f32 %v875_v21, %v874_v20 }
 0x38e   : > { %v877_v25 = vrot.slane %v876_v18, 4 }
 0x390   : > { %v878_v47 = vadd.f32 %v877_v25, %v876_v18 }
 0x392   : > { %v879_v49 = vrot.slane %v878_v47, 2 }
 0x394   : > { %v880_v51 = vadd.f32 %v879_v49, %v878_v47 }
 0x396   : > { %v881_v44 = vrot.slane %v880_v51, 1 }
 0x398   : > { %v882_v52 = vadd.f32 %v881_v44, %v880_v51 }
 0x39a   : > { %v883_v54 = vmul.f32 0.015625, %v882_v52 }
 0x39c   : > { %v884_v50 = vadd.f32 1e-05, %v883_v54 }
 0x39e   : > { %2158 = vrsqrt.f32 %v884_v50 }
 0x3a8   : > { %v2482_v57 = vpop.eup %2158 }
 0x3a9   : > { %v2485_v15 = vmul.f32 %v2482_v57, %v852_v14  ;;  %v2488_v22 = vmul.f32 %v2482_v57, %v848_v13  ;;  %v2491_v23 = vmul.f32 %v2482_v57, %v846_v11  ;;  %v2494_v16 = vmul.f32 %v2482_v57, %v849_v38 }
 0x3aa   : > { %v2500_v55 = vmul.f32 %v2482_v57, %v847_v12  ;;  %v2503_v9 = vmul.f32 %v2482_v57, %v851_v37  ;;  %v2506_v14 = vmul.f32 %v2482_v57, %v850_v26  ;;  %v2509_v13 = vmul.f32 %v2482_v57, %v853_v27 }
 0x3ab   : > { %v904_v11 = vmul.f32 %v897_v48, %v2485_v15  ;;  %v900_v38 = vmul.f32 %v897_v48, %v2488_v22  ;;  %v898_v10 = vmul.f32 %v897_v48, %v2491_v23  ;;  %v901_v20 = vmul.f32 %v897_v48, %v2494_v16 }
 0x3ac   : > { %v899_v12 = vmul.f32 %v897_v48, %v2500_v55  ;;  %v903_v21 = vmul.f32 %v897_v48, %v2503_v9  ;;  %v902_v26 = vmul.f32 %v897_v48, %v2506_v14  ;;  %v905_v27 = vmul.f32 %v897_v48, %v2509_v13  ;;  %v1843_v48 = vld [vmem:[%s2886_s2 + $0x9] ss:$0 sm:$0xff] }
 0x3ad   : > { %v916_v37 = vadd.f32 %v1842_v24, %v904_v11  ;;  %v912_v18 = vadd.f32 %v1842_v24, %v900_v38  ;;  %v910_v25 = vadd.f32 %v1842_v24, %v898_v10  ;;  %v913_v47 = vadd.f32 %v1842_v24, %v901_v20 }
 0x3ae   : > { %v911_v49 = vadd.f32 %v1842_v24, %v899_v12  ;;  %v915_v51 = vadd.f32 %v1842_v24, %v903_v21  ;;  %v914_v44 = vadd.f32 %v1842_v24, %v902_v26  ;;  %v917_v52 = vadd.f32 %v1842_v24, %v905_v27 }
 0x3af   : > { %2160 = vtanh.f32 %v916_v37 }
 0x3b0   : > { %2162 = vtanh.f32 %v912_v18 }
 0x3b1   : > { %2164 = vtanh.f32 %v910_v25 }
 0x3b2   : > { %2166 = vtanh.f32 %v913_v47 }
 0x3b3   : > { %2168 = vtanh.f32 %v911_v49 }
 0x3b4   : > { %2170 = vtanh.f32 %v915_v51 }
 0x3b5   : > { %2172 = vtanh.f32 %v914_v44 }
 0x3b6   : > { %2174 = vtanh.f32 %v917_v52 }
 0x3b9   : > { %v2161_v54 = vpop.eup %2160 }
 0x3ba   : > { %v2163_v50 = vpop.eup %2162 }
 0x3bb   : > { %v2165_v11 = vpop.eup %2164  ;;  %v929_v38 = vmul.f32 %v2163_v50, %v2163_v50 }
 0x3bc   : > { %v2167_v10 = vpop.eup %2166  ;;  %v927_v20 = vmul.f32 %v2165_v11, %v2165_v11 }
 0x3bd   : > { %v2169_v12 = vpop.eup %2168  ;;  %v937_v21 = vsub.f32 1.0, %v929_v38  ;;  %v930_v37 = vmul.f32 %v2167_v10, %v2167_v10 }
 0x3be   : > { %v2171_v18 = vpop.eup %2170  ;;  %v935_v25 = vsub.f32 1.0, %v927_v20  ;;  %v928_v24 = vmul.f32 %v2169_v12, %v2169_v12 }
 0x3bf   : > { %v2173_v26 = vpop.eup %2172  ;;  %v2522_v47 = vmul.f32 %v1843_v48, %v937_v21  ;;  %v938_v27 = vsub.f32 1.0, %v930_v37  ;;  %v932_v49 = vmul.f32 %v2171_v18, %v2171_v18  ;;  %v933_v37 = vmul.f32 %v2161_v54, %v2161_v54 }
 0x3c0   : > { %v2175_v51 = vpop.eup %2174  ;;  %v2524_v44 = vmul.f32 %v1843_v48, %v935_v25  ;;  %v936_v52 = vsub.f32 1.0, %v928_v24  ;;  %v931_v50 = vmul.f32 %v2173_v26, %v2173_v26 }
 0x3c1   : > { %v957_v45 = vmul.f32 %v2522_v47, %v2488_v22  ;;  %v2528_v11 = vmul.f32 %v1843_v48, %v938_v27  ;;  %v940_v38 = vsub.f32 1.0, %v932_v49  ;;  %v934_v10 = vmul.f32 %v2175_v51, %v2175_v51 }
 0x3c2   : > { %v955_v20 = vmul.f32 %v2524_v44, %v2491_v23  ;;  %v2532_v12 = vmul.f32 %v1843_v48, %v936_v52  ;;  %v939_v21 = vsub.f32 1.0, %v931_v50  ;;  %v941_v49 = vsub.f32 1.0, %v933_v37  ;;  %v1812_v37 = vld [vmem:[%s2885_s1 + $0xb8] sm:$0xff] }
 0x3c3   : > { %975 = vrot.lane.b32.xlu1 %v957_v45, %s2186_s11  ;;  %v958_v18 = vmul.f32 %v2528_v11, %v2494_v16  ;;  %v2538_v25 = vmul.f32 %v1843_v48, %v940_v38  ;;  %v942_v24 = vsub.f32 1.0, %v934_v10  ;;  %v1809_v10 = vld [vmem:[%s2885_s1 + $0xa0] sm:$0xff] }
 0x3c4   : > { %971 = vrot.lane.b32.xlu0 %v955_v20, %s2186_s11  ;;  %v956_v26 = vmul.f32 %v2532_v12, %v2500_v55  ;;  %v2542_v27 = vmul.f32 %v1843_v48, %v939_v21  ;;  %v2552_v52 = vmul.f32 %v1843_v48, %v941_v49  ;;  %v1811_v20 = vld [vmem:[%s2885_s1 + $0xb0] sm:$0xff] }
 0x3c5   : > { %v960_v45 = vmul.f32 %v2538_v25, %v2503_v9  ;;  %v2548_v54 = vmul.f32 %v1843_v48, %v942_v24  ;;  %v1810_v48 = vld [vmem:[%s2885_s1 + $0xa8] sm:$0xff] }
 0x3c6   : > { %v959_v51 = vmul.f32 %v2542_v27, %v2506_v14  ;;  %v961_v38 = vmul.f32 %v2552_v52, %v2485_v15  ;;  %v2088_v21 = vpack.c.bf16 %v1810_v48, %v1809_v10 }
 0x3c7   : > { %977 = vrot.lane.b32.xlu1 %v958_v18, %s2186_s11  ;;  %v962_v50 = vmul.f32 %v2548_v54, %v2509_v13  ;;  %v2092_v18 = vpack.c.bf16 %v1812_v37, %v1811_v20 }
 0x3c8   : > { %973 = vrot.lane.b32.xlu0 %v956_v26, %s2186_s11  ;;  %2089 = vmatprep.subr.bf16.mxu1 %v2088_v21 }
 0x3c9   : > { %2091 = vmatpush3.bf16.msra.mxu1 %v2088_v21 }
 0x3ca   : > { %2093 = vmatprep.subr.bf16.mxu1 %v2092_v18 }
 0x3cb   : > { %981 = vrot.lane.b32.xlu1 %v960_v45, %s2186_s11 }
 0x3cc   : > { %979 = vrot.lane.b32.xlu0 %v959_v51, %s2186_s11 }
 0x3cd   : > { %2095 = vmatpush3.bf16.msra.mxu1 %v2092_v18 }
 0x3cf   : > { %985 = vrot.lane.b32.xlu1 %v962_v50, %s2186_s11 }
 0x3d0   : > { %983 = vrot.lane.b32.xlu0 %v961_v38, %s2186_s11 }
 0x435   : > { %v976_v24 = vpop.permute.xlu1 %975 }
 0x436   : > { %v972_v26 = vpop.permute.xlu0 %971  ;;  %v997_v50 = vsel %vm222_vm0, %v2522_v47, %v976_v24 }
 0x437   : > { %v995_v49 = vsel %vm222_vm0, %v2524_v44, %v972_v26  ;;  %v1007_v18 = vsel %vm1003_vm1, %v997_v50, 0.0 }
 0x438   : > { %v1004_v10 = vsel %vm1003_vm1, %v995_v49, 0.0 }
 0x439   : > { %v978_v45 = vpop.permute.xlu1 %977 }
 0x43a   : > { %v974_v51 = vpop.permute.xlu0 %973  ;;  %v998_v20 = vsel %vm222_vm0, %v2528_v11, %v978_v45 }
 0x43b   : > { %v996_v38 = vsel %vm222_vm0, %v2532_v12, %v974_v51  ;;  %v1009_v24 = vsel %vm1003_vm1, %v998_v20, 0.0 }
 0x43c   : > { %v1005_v48 = vsel %vm1003_vm1, %v996_v38, 0.0 }
 0x43d   : > { %v1006_v21 = vadd.f32 %v1005_v48, %v1004_v10  ;;  %v982_v37 = vpop.permute.xlu1 %981 }
 0x43e   : > { %v980_v26 = vpop.permute.xlu0 %979  ;;  %v1000_v51 = vsel %vm222_vm0, %v2538_v25, %v982_v37 }
 0x43f   : > { %v1008_v42 = vadd.f32 %v1007_v18, %v1006_v21  ;;  %v999_v43 = vsel %vm222_vm0, %v2542_v27, %v980_v26  ;;  %v1013_v50 = vsel %vm1003_vm1, %v1000_v51, 0.0 }
 0x440   : > { %v1011_v38 = vsel %vm1003_vm1, %v999_v43, 0.0 }
 0x441   : > { %v1010_v49 = vadd.f32 %v1009_v24, %v1008_v42  ;;  %v986_v6 = vpop.permute.xlu1 %985 }
 0x442   : > { %v984_v40 = vpop.permute.xlu0 %983  ;;  %v1002_v48 = vsel %vm222_vm0, %v2548_v54, %v986_v6 }
 0x443   : > { %v1012_v45 = vadd.f32 %v1011_v38, %v1010_v49  ;;  %v1001_v10 = vsel %vm222_vm0, %v2552_v52, %v984_v40  ;;  %v1017_v37 = vsel %vm1003_vm1, %v1002_v48, 0.0  ;;  %v926_v40 = vmul.f32 %v2482_v57, %v2478_v53 }
 0x444   : > { %v1015_v20 = vsel %vm1003_vm1, %v1001_v10, 0.0 }
 0x445   : > { %v1014_v21 = vadd.f32 %v1013_v50, %v1012_v45  ;;  %v1057_v6 = vrot.slane %v926_v40, %v2275_v36 }
 0x447   : > { %v1016_v18 = vadd.f32 %v1015_v20, %v1014_v21 }
 0x449   : > { %v1018_v42 = vadd.f32 %v1017_v37, %v1016_v18 }
 0x44b   : > { %v1019_v26 = vrot.slane %v1018_v42, 4 }
 0x44d   : > { %v1020_v43 = vadd.f32 %v1019_v26, %v1018_v42 }
 0x44f   : > { %v1021_v24 = vrot.slane %v1020_v43, 2 }
 0x451   : > { %v1022_v7 = vadd.f32 %v1021_v24, %v1020_v43 }
 0x453   : > { %v1023_v49 = vrot.slane %v1022_v7, 1 }
 0x455   : > { %v1024_v38 = vadd.f32 %v1023_v49, %v1022_v7 }
 0x457   : > { %v1025_v41 = vmul.f32 0.015625, %v1024_v38 }
 0x459   : > { %1035 = vrot.lane.b32.xlu0 %v1025_v41, %s2187_s23  ;;  %v1026_v51 = vsub.f32 %v2524_v44, %v1025_v41  ;;  %v1027_v45 = vsub.f32 %v2532_v12, %v1025_v41  ;;  %v1028_v10 = vsub.f32 %v2522_v47, %v1025_v41  ;;  %v1029_v50 = vsub.f32 %v2528_v11, %v1025_v41 }
 0x45a   : > { %v1030_v7 = vsub.f32 %v2542_v27, %v1025_v41  ;;  %v1031_v21 = vsub.f32 %v2538_v25, %v1025_v41  ;;  %v1032_v20 = vsub.f32 %v2552_v52, %v1025_v41  ;;  %v1033_v18 = vsub.f32 %v2548_v54, %v1025_v41 }
 0x4cb   : > { %v1036_v48 = vpop.permute.xlu0 %1035 }
 0x4cc   : > { %v1039_v53 = vmul.f32 %v1036_v48, %v2500_v55  ;;  %v1038_v57 = vmul.f32 %v1036_v48, %v2491_v23  ;;  %v1040_v44 = vmul.f32 %v1036_v48, %v2488_v22  ;;  %v1041_v12 = vmul.f32 %v1036_v48, %v2494_v16 }
 0x4cd   : > { %v1042_v47 = vmul.f32 %v1036_v48, %v2506_v14  ;;  %v1043_v11 = vmul.f32 %v1036_v48, %v2503_v9  ;;  %v1044_v27 = vmul.f32 %v1036_v48, %v2485_v15  ;;  %v1045_v25 = vmul.f32 %v1036_v48, %v2509_v13 }
 0x4ce   : > { %v1046_v37 = vsub.f32 %v1026_v51, %v1038_v57  ;;  %v1047_v52 = vsub.f32 %v1027_v45, %v1039_v53  ;;  %v1048_v42 = vsub.f32 %v1028_v10, %v1040_v44  ;;  %v1049_v41 = vsub.f32 %v1029_v50, %v1041_v12 }
 0x4cf   : > { %v1050_v54 = vsub.f32 %v1030_v7, %v1042_v47  ;;  %v1051_v55 = vsub.f32 %v1031_v21, %v1043_v11  ;;  %v1052_v26 = vsub.f32 %v1032_v20, %v1044_v27  ;;  %v1053_v23 = vsub.f32 %v1033_v18, %v1045_v25 }
 0x4d0   : > { %v1058_v43 = vmul.f32 %v1057_v6, %v1046_v37  ;;  %v1059_v22 = vmul.f32 %v1057_v6, %v1047_v52  ;;  %v1060_v24 = vmul.f32 %v1057_v6, %v1048_v42  ;;  %v1061_v16 = vmul.f32 %v1057_v6, %v1049_v41 }
 0x4d1   : > { %v1062_v49 = vmul.f32 %v1057_v6, %v1050_v54  ;;  %v1063_v14 = vmul.f32 %v1057_v6, %v1051_v55  ;;  %v1064_v38 = vmul.f32 %v1057_v6, %v1052_v26  ;;  %v1065_v9 = vmul.f32 %v1057_v6, %v1053_v23 }
 0x4d2   : > { %2012 = vmatprep.mubr.msk.f32.mxu1 %vm222_vm0, %v1058_v43  ;;  %v1196_v15 = vmul.f32 %v2426_v29, %v2426_v29  ;;  %v1195_v13 = vmul.f32 %v2424_v28, %v2424_v28  ;;  %v1198_v6 = vmul.f32 %v2436_v31, %v2436_v31  ;;  %v1197_v10 = vmul.f32 %v2430_v30, %v2430_v30 }
 0x4d3   : > { %2013 = vmatmul.mubr.msk.f32.vlgmr.msra.gmra.mrb[8].mxu1 %vm222_vm0, %v1059_v22  ;;  %v1200_v28 = vmul.f32 %v2444_v33, %v2444_v33  ;;  %v1199_v30 = vmul.f32 %v2438_v32, %v2438_v32  ;;  %v1202_v47 = vmul.f32 %v2452_v35, %v2452_v35  ;;  %v1201_v25 = vmul.f32 %v2446_v34, %v2446_v34 }
 0x4d4   : > { %2015 = vmatprep.mubr.msk.f32.mxu1 %vm222_vm0, %v1060_v24  ;;  %v1204_v40 = vsub.f32 1.0, %v1196_v15  ;;  %v1203_v45 = vsub.f32 1.0, %v1195_v13  ;;  %v1206_v21 = vsub.f32 1.0, %v1198_v6  ;;  %v1205_v18 = vsub.f32 1.0, %v1197_v10 }
 0x4d5   : > { %v1208_v12 = vsub.f32 1.0, %v1200_v28  ;;  %v1207_v27 = vsub.f32 1.0, %v1199_v30  ;;  %v1210_v41 = vsub.f32 1.0, %v1202_v47  ;;  %v1209_v55 = vsub.f32 1.0, %v1201_v25 }
 0x4d7   : > { %2016 = vmatmul.mubr.msk.f32.gmra.mrb[10].mxu1 %vm222_vm0, %v1061_v16  ;;  %v1805_v16 = vld [vmem:[%s2885_s1 + $0x80] sm:$0xff] }
 0x4d8   : > { %2018 = vmatprep.mubr.msk.f32.mxu1 %vm222_vm0, %v1062_v49  ;;  %v1806_v49 = vld [vmem:[%s2885_s1 + $0x88] sm:$0xff] }
 0x4db   : > { %2019 = vmatmul.mubr.msk.f32.gmra.mrb[12].mxu1 %vm222_vm0, %v1063_v14  ;;  %v1807_v14 = vld [vmem:[%s2885_s1 + $0x90] sm:$0xff] }
 0x4dc   : > { %2021 = vmatprep.mubr.msk.f32.mxu1 %vm222_vm0, %v1064_v38  ;;  %v2096_v38 = vpack.c.bf16 %v1806_v49, %v1805_v16 }
 0x4de   : > { %2097 = vmatprep.subr.bf16.mxu0 %v2096_v38 }
 0x4df   : > { %2022 = vmatmul.mubr.msk.f32.gmra.mrb[14].mxu1 %vm222_vm0, %v1065_v9  ;;  %v1808_v9 = vld [vmem:[%s2885_s1 + $0x98] sm:$0xff]  ;;  %2099 = vmatpush3.bf16.msra.mxu0 %v2096_v38 }
 0x4e0   : > { %v2100_v15 = vpack.c.bf16 %v1808_v9, %v1807_v14 }
 0x4e2   : > { %2101 = vmatprep.subr.bf16.mxu0 %v2100_v15 }
 0x4e3   : > { %2103 = vmatpush3.bf16.msra.mxu0 %v2100_v15 }
 0x5a6   : > { %v2014_v51 = vpop.f32.mrb[8].mxu1 }
 0x5a7   : > { %v2634_v50 = vmul.f32 %v2014_v51, %v1204_v40  ;;  %v1156_v48 = vpop.f32.mrb[9].mxu1 }
 0x5a8   : > { %v2636_v7 = vmul.f32 %v1203_v45, %v1156_v48 }
 0x5a9   : > { %v1220_v29 = vmul.f32 %v2634_v50, %v2393_v60 }
 0x5aa   : > { %v2017_v20 = vpop.f32.mrb[10].mxu1  ;;  %v1219_v31 = vmul.f32 %v2636_v7, %v2390_v59 }
 0x5ab   : > { %v2646_v53 = vmul.f32 %v2017_v20, %v1206_v21  ;;  %1237 = vrot.lane.b32.xlu0 %v1220_v29, %s2186_s11  ;;  %v1166_v57 = vpop.f32.mrb[11].mxu1 }
 0x5ac   : > { %v2649_v44 = vmul.f32 %v1205_v18, %v1166_v57  ;;  %1235 = vrot.lane.b32.xlu1 %v1219_v31, %s2186_s11 }
 0x5ad   : > { %v1222_v33 = vmul.f32 %v2646_v53, %v2399_v62 }
 0x5ae   : > { %v2020_v11 = vpop.f32.mrb[12].mxu1  ;;  %v1221_v32 = vmul.f32 %v2649_v44, %v2396_v61 }
 0x5af   : > { %v2660_v37 = vmul.f32 %v2020_v11, %v1208_v12  ;;  %1241 = vrot.lane.b32.xlu0 %v1222_v33, %s2186_s11  ;;  %v1176_v52 = vpop.f32.mrb[13].mxu1 }
 0x5b0   : > { %v2663_v42 = vmul.f32 %v1207_v27, %v1176_v52  ;;  %1239 = vrot.lane.b32.xlu1 %v1221_v32, %s2186_s11 }
 0x5b1   : > { %v1224_v35 = vmul.f32 %v2660_v37, %v2408_v19 }
 0x5b2   : > { %v2023_v54 = vpop.f32.mrb[14].mxu1  ;;  %v1223_v26 = vmul.f32 %v2663_v42, %v2405_v17 }
 0x5b3   : > { %v2670_v23 = vmul.f32 %v2023_v54, %v1210_v41  ;;  %1245 = vrot.lane.b32.xlu0 %v1224_v35, %s2186_s11  ;;  %v1186_v34 = vpop.f32.mrb[15].mxu1 }
 0x5b4   : > { %v2673_v43 = vmul.f32 %v1209_v55, %v1186_v34  ;;  %1243 = vrot.lane.b32.xlu1 %v1223_v26, %s2186_s11 }
 0x5b5   : > { %v1226_v22 = vmul.f32 %v2670_v23, %v2414_v8 }
 0x5b6   : > { %v1225_v24 = vmul.f32 %v2673_v43, %v2411_v0 }
 0x5b7   : > { %1249 = vrot.lane.b32.xlu0 %v1226_v22, %s2186_s11 }
 0x5b8   : > { %1247 = vrot.lane.b32.xlu1 %v1225_v24, %s2186_s11 }
 0x61d   : > { %v1238_v13 = vpop.permute.xlu0 %1237 }
 0x61e   : > { %v1260_v40 = vsel %vm222_vm0, %v2634_v50, %v1238_v13  ;;  %v1236_v6 = vpop.permute.xlu1 %1235 }
 0x61f   : > { %v1259_v51 = vsel %vm222_vm0, %v2636_v7, %v1236_v6  ;;  %v1268_v45 = vsel %vm1003_vm1, %v1260_v40, 0.0  ;;  %v690_v40 = vmul.f32 %v2387_v58, %v2383_v56 }
 0x620   : > { %v1267_v10 = vsel %vm1003_vm1, %v1259_v51, 0.0 }
 0x621   : > { %v1242_v48 = vpop.permute.xlu0 %1241  ;;  %v1269_v29 = vadd.f32 %v1268_v45, %v1267_v10  ;;  %v1320_v6 = vrot.slane %v690_v40, %v2275_v36 }
 0x622   : > { %v1240_v21 = vpop.permute.xlu1 %1239  ;;  %v1262_v28 = vsel %vm222_vm0, %v2646_v53, %v1242_v48 }
 0x623   : > { %v1261_v20 = vsel %vm222_vm0, %v2649_v44, %v1240_v21  ;;  %v1272_v57 = vsel %vm1003_vm1, %v1262_v28, 0.0 }
 0x624   : > { %v1270_v18 = vsel %vm1003_vm1, %v1261_v20, 0.0 }
 0x625   : > { %v1271_v31 = vadd.f32 %v1270_v18, %v1269_v29  ;;  %v1246_v30 = vpop.permute.xlu0 %1245 }
 0x626   : > { %v1244_v12 = vpop.permute.xlu1 %1243  ;;  %v1264_v33 = vsel %vm222_vm0, %v2660_v37, %v1246_v30 }
 0x627   : > { %v1273_v47 = vadd.f32 %v1272_v57, %v1271_v31  ;;  %v1263_v11 = vsel %vm222_vm0, %v2663_v42, %v1244_v12  ;;  %v1276_v52 = vsel %vm1003_vm1, %v1264_v33, 0.0 }
 0x628   : > { %v1274_v27 = vsel %vm1003_vm1, %v1263_v11, 0.0 }
 0x629   : > { %v1275_v32 = vadd.f32 %v1274_v27, %v1273_v47  ;;  %v1250_v25 = vpop.permute.xlu0 %1249 }
 0x62a   : > { %v1248_v41 = vpop.permute.xlu1 %1247  ;;  %v1266_v35 = vsel %vm222_vm0, %v2670_v23, %v1250_v25  ;;  %v1461_v25 = vmul.f32 %v2329_v3, %v2329_v3 }
 0x62b   : > { %v1277_v54 = vadd.f32 %v1276_v52, %v1275_v32  ;;  %v1265_v55 = vsel %vm222_vm0, %v2673_v43, %v1248_v41  ;;  %v1280_v22 = vsel %vm1003_vm1, %v1266_v35, 0.0  ;;  %v1460_v35 = vmul.f32 %v2323_v2, %v2323_v2 }
 0x62c   : > { %v1278_v26 = vsel %vm1003_vm1, %v1265_v55, 0.0  ;;  %v1462_v2 = vmul.f32 %v2331_v4, %v2331_v4 }
 0x62d   : > { %v1279_v34 = vadd.f32 %v1278_v26, %v1277_v54 }
 0x62f   : > { %v1281_v24 = vadd.f32 %v1280_v22, %v1279_v34  ;;  %v1469_v34 = vsub.f32 1.0, %v1461_v25 }
 0x631   : > { %v1282_v16 = vrot.slane %v1281_v24, 4 }
 0x633   : > { %v1283_v49 = vadd.f32 %v1282_v16, %v1281_v24  ;;  %v1468_v24 = vsub.f32 1.0, %v1460_v35 }
 0x635   : > { %v1284_v14 = vrot.slane %v1283_v49, 2 }
 0x637   : > { %v1285_v38 = vadd.f32 %v1284_v14, %v1283_v49 }
 0x639   : > { %v1286_v9 = vrot.slane %v1285_v38, 1 }
 0x63b   : > { %v1287_v15 = vadd.f32 %v1286_v9, %v1285_v38  ;;  %v2912_v9 = vld [vmem:[#allocation4_spill] sm:$0xff] }
 0x63d   : > { %v1288_v13 = vmul.f32 0.015625, %v1287_v15  ;;  %v2913_v15 = vld [vmem:[#allocation10_spill] sm:$0xff] }
 0x63f   : > { %1298 = vrot.lane.b32.xlu1 %v1288_v13, %s2187_s23  ;;  %v1289_v51 = vsub.f32 %v2636_v7, %v1288_v13  ;;  %v1290_v45 = vsub.f32 %v2634_v50, %v1288_v13  ;;  %v1291_v10 = vsub.f32 %v2649_v44, %v1288_v13  ;;  %v1292_v48 = vsub.f32 %v2646_v53, %v1288_v13 }
 0x640   : > { %v1293_v29 = vsub.f32 %v2663_v42, %v1288_v13  ;;  %v1294_v28 = vsub.f32 %v2660_v37, %v1288_v13  ;;  %v1295_v20 = vsub.f32 %v2673_v43, %v1288_v13  ;;  %v1296_v18 = vsub.f32 %v2670_v23, %v1288_v13 }
 0x641   : > { %v1465_v13 = vmul.f32 %v2913_v15, %v2913_v15 }
 0x6b1   : > { %v1299_v21 = vpop.permute.xlu1 %1298 }
 0x6b2   : > { %v1302_v56 = vmul.f32 %v1299_v21, %v2393_v60  ;;  %v1301_v58 = vmul.f32 %v1299_v21, %v2390_v59  ;;  %v1303_v7 = vmul.f32 %v1299_v21, %v2396_v61  ;;  %v1304_v50 = vmul.f32 %v1299_v21, %v2399_v62 }
 0x6b3   : > { %v1305_v44 = vmul.f32 %v1299_v21, %v2405_v17  ;;  %v1306_v53 = vmul.f32 %v1299_v21, %v2408_v19  ;;  %v1307_v42 = vmul.f32 %v1299_v21, %v2411_v0  ;;  %v1308_v37 = vmul.f32 %v1299_v21, %v2414_v8 }
 0x6b4   : > { %v1309_v31 = vsub.f32 %v1289_v51, %v1301_v58  ;;  %v1310_v43 = vsub.f32 %v1290_v45, %v1302_v56  ;;  %v1311_v30 = vsub.f32 %v1291_v10, %v1303_v7  ;;  %v1312_v23 = vsub.f32 %v1292_v48, %v1304_v50  ;;  %v2914_v51 = vld [vmem:[#allocation3_spill] sm:$0xff]  ;;  %v2915_v45 = vld [vmem:[#allocation9_spill] sm:$0xff] }
 0x6b5   : > { %v1313_v57 = vsub.f32 %v1293_v29, %v1305_v44  ;;  %v1314_v60 = vsub.f32 %v1294_v28, %v1306_v53  ;;  %v1315_v12 = vsub.f32 %v1295_v20, %v1307_v42  ;;  %v1316_v59 = vsub.f32 %v1296_v18, %v1308_v37  ;;  %v2916_v20 = vld [vmem:[#allocation6_spill] sm:$0xff]  ;;  %v2917_v7 = vld [vmem:[#allocation5_spill] sm:$0xff]  ;;  %v2918_v37 = vld [vmem:[#allocation8_spill] sm:$0xff] }
 0x6b6   : > { %v1321_v33 = vmul.f32 %v1320_v6, %v1309_v31  ;;  %v1322_v61 = vmul.f32 %v1320_v6, %v1310_v43  ;;  %v1323_v47 = vmul.f32 %v1320_v6, %v1311_v30  ;;  %v1324_v62 = vmul.f32 %v1320_v6, %v1312_v23  ;;  %v2919_v43 = vld [vmem:[#allocation7_spill] sm:$0xff]  ;;  %v1801_v23 = vld [vmem:[%s2885_s1 + $0x60] sm:$0xff] }
 0x6b7   : > { %v1325_v11 = vmul.f32 %v1320_v6, %v1313_v57  ;;  %v1326_v17 = vmul.f32 %v1320_v6, %v1314_v60  ;;  %v1327_v27 = vmul.f32 %v1320_v6, %v1315_v12  ;;  %v1328_v19 = vmul.f32 %v1320_v6, %v1316_v59  ;;  %v1802_v57 = vld [vmem:[%s2885_s1 + $0x68] sm:$0xff]  ;;  %v1803_v60 = vld [vmem:[%s2885_s1 + $0x70] sm:$0xff]  ;;  %v1804_v59 = vld [vmem:[%s2885_s1 + $0x78] sm:$0xff] }
 0x6b8   : > { %2032 = vmatprep.mubr.msk.f32.mxu0 %vm222_vm0, %v1321_v33  ;;  %v1459_v0 = vmul.f32 %v2317_v63, %v2317_v63  ;;  %v1458_v8 = vmul.f32 %v2319_v1, %v2319_v1  ;;  %v1463_v1 = vmul.f32 %v2337_v5, %v2337_v5  ;;  %v1470_v6 = vsub.f32 1.0, %v1462_v2 }
 0x6b9   : > { %2033 = vmatmul.mubr.msk.f32.vlgmr.msra.gmra.mrb[16].mxu0 %vm222_vm0, %v1322_v61  ;;  %v1464_v10 = vmul.f32 %v2915_v45, %v2915_v45  ;;  %v1473_v28 = vsub.f32 1.0, %v1465_v13  ;;  %v2104_v12 = vpack.c.bf16 %v1802_v57, %v1801_v23  ;;  %v2108_v33 = vpack.c.bf16 %v1804_v59, %v1803_v60 }
 0x6ba   : > { %2035 = vmatprep.mubr.msk.f32.mxu0 %vm222_vm0, %v1323_v47  ;;  %v1467_v32 = vsub.f32 1.0, %v1459_v0  ;;  %v1466_v41 = vsub.f32 1.0, %v1458_v8  ;;  %v1471_v38 = vsub.f32 1.0, %v1463_v1 }
 0x6bb   : > { %v1472_v58 = vsub.f32 1.0, %v1464_v10  ;;  %2105 = vmatprep.subr.bf16.mxu1 %v2104_v12 }
 0x6bc   : > { %2107 = vmatpush3.bf16.msra.mxu1 %v2104_v12 }
 0x6bd   : > { %2036 = vmatmul.mubr.msk.f32.gmra.mrb[18].mxu0 %vm222_vm0, %v1324_v62  ;;  %2109 = vmatprep.subr.bf16.mxu1 %v2108_v33 }
 0x6be   : > { %2038 = vmatprep.mubr.msk.f32.mxu0 %vm222_vm0, %v1325_v11 }
 0x6c0   : > { %2111 = vmatpush3.bf16.msra.mxu1 %v2108_v33 }
 0x6c1   : > { %2039 = vmatmul.mubr.msk.f32.gmra.mrb[20].mxu0 %vm222_vm0, %v1326_v17 }
 0x6c2   : > { %2041 = vmatprep.mubr.msk.f32.mxu0 %vm222_vm0, %v1327_v27 }
 0x6c5   : > { %2042 = vmatmul.mubr.msk.f32.gmra.mrb[22].mxu0 %vm222_vm0, %v1328_v19 }
 0x78c   : > { %v2034_v52 = vpop.f32.mrb[16].mxu0 }
 0x78d   : > { %v2754_v54 = vmul.f32 %v2034_v52, %v1467_v32  ;;  %v1419_v55 = vpop.f32.mrb[17].mxu0 }
 0x78e   : > { %v2756_v26 = vmul.f32 %v1466_v41, %v1419_v55 }
 0x78f   : > { %v1483_v63 = vmul.f32 %v2754_v54, %v2283_v39 }
 0x790   : > { %v2037_v22 = vpop.f32.mrb[18].mxu0  ;;  %v1482_v3 = vmul.f32 %v2756_v26, %v2304_v46 }
 0x791   : > { %v2766_v16 = vmul.f32 %v2037_v22, %v1469_v34  ;;  %1500 = vrot.lane.b32.xlu1 %v1483_v63, %s2186_s11  ;;  %v1429_v49 = vpop.f32.mrb[19].mxu0 }
 0x792   : > { %v2769_v14 = vmul.f32 %v1468_v24, %v1429_v49  ;;  %1498 = vrot.lane.b32.xlu0 %v1482_v3, %s2186_s11 }
 0x793   : > { %v1485_v5 = vmul.f32 %v2766_v16, %v2912_v9 }
 0x794   : > { %v2040_v40 = vpop.f32.mrb[20].mxu0  ;;  %v1484_v4 = vmul.f32 %v2769_v14, %v2914_v51 }
 0x795   : > { %v2780_v48 = vmul.f32 %v2040_v40, %v1471_v38  ;;  %1504 = vrot.lane.b32.xlu1 %v1485_v5, %s2186_s11  ;;  %v1439_v21 = vpop.f32.mrb[21].mxu0 }
 0x796   : > { %v2783_v29 = vmul.f32 %v1470_v6, %v1439_v21  ;;  %1502 = vrot.lane.b32.xlu0 %v1484_v4, %s2186_s11 }
 0x797   : > { %v1487_v18 = vmul.f32 %v2780_v48, %v2916_v20 }
 0x798   : > { %v2043_v56 = vpop.f32.mrb[22].mxu0  ;;  %v1486_v50 = vmul.f32 %v2783_v29, %v2917_v7 }
 0x799   : > { %v2790_v44 = vmul.f32 %v2043_v56, %v1473_v28  ;;  %1508 = vrot.lane.b32.xlu1 %v1487_v18, %s2186_s11  ;;  %v1449_v53 = vpop.f32.mrb[23].mxu0 }
 0x79a   : > { %v2793_v42 = vmul.f32 %v1472_v58, %v1449_v53  ;;  %1506 = vrot.lane.b32.xlu0 %v1486_v50, %s2186_s11  ;;  %v2176_v53 = vld [vmem:[%s2886_s2 + $0x1] sm:$0x1] }
 0x79b   : > { %v1489_v31 = vmul.f32 %v2790_v44, %v2918_v37 }
 0x79c   : > { %v1488_v30 = vmul.f32 %v2793_v42, %v2919_v43 }
 0x79d   : > { %1512 = vrot.lane.b32.xlu1 %v1489_v31, %s2186_s11  ;;  %v2920_v31 = vld [vmem:[#allocation2_spill] sm:$0xff] }
 0x79e   : > { %1510 = vrot.lane.b32.xlu0 %v1488_v30, %s2186_s11  ;;  %v454_v30 = vmul.f32 %v2176_v53, %v2920_v31 }
 0x7a0   : > { %v1583_v23 = vrot.slane %v454_v30, %v2275_v36 }
 0x803   : > { %v1501_v61 = vpop.permute.xlu1 %1500 }
 0x804   : > { %v1523_v47 = vsel %vm222_vm0, %v2754_v54, %v1501_v61  ;;  %v1499_v62 = vpop.permute.xlu0 %1498 }
 0x805   : > { %v1522_v11 = vsel %vm222_vm0, %v2756_v26, %v1499_v62  ;;  %v1531_v17 = vsel %vm1003_vm1, %v1523_v47, 0.0 }
 0x806   : > { %v1530_v27 = vsel %vm1003_vm1, %v1522_v11, 0.0 }
 0x807   : > { %v1505_v19 = vpop.permute.xlu1 %1504  ;;  %v1532_v8 = vadd.f32 %v1531_v17, %v1530_v27 }
 0x808   : > { %v1503_v0 = vpop.permute.xlu0 %1502  ;;  %v1525_v32 = vsel %vm222_vm0, %v2766_v16, %v1505_v19 }
 0x809   : > { %v1524_v25 = vsel %vm222_vm0, %v2769_v14, %v1503_v0  ;;  %v1535_v55 = vsel %vm1003_vm1, %v1525_v32, 0.0 }
 0x80a   : > { %v1533_v52 = vsel %vm1003_vm1, %v1524_v25, 0.0 }
 0x80b   : > { %v1534_v41 = vadd.f32 %v1533_v52, %v1532_v8  ;;  %v1509_v35 = vpop.permute.xlu1 %1508 }
 0x80c   : > { %v1507_v34 = vpop.permute.xlu0 %1506  ;;  %v1527_v63 = vsel %vm222_vm0, %v2780_v48, %v1509_v35 }
 0x80d   : > { %v1536_v1 = vadd.f32 %v1535_v55, %v1534_v41  ;;  %v1526_v22 = vsel %vm222_vm0, %v2783_v29, %v1507_v34  ;;  %v1539_v49 = vsel %vm1003_vm1, %v1527_v63, 0.0 }
 0x80e   : > { %v1537_v24 = vsel %vm1003_vm1, %v1526_v22, 0.0 }
 0x80f   : > { %v1538_v3 = vadd.f32 %v1537_v24, %v1536_v1  ;;  %v1513_v2 = vpop.permute.xlu1 %1512 }
 0x810   : > { %v1511_v38 = vpop.permute.xlu0 %1510  ;;  %v1529_v5 = vsel %vm222_vm0, %v2790_v44, %v1513_v2 }
 0x811   : > { %v1540_v15 = vadd.f32 %v1539_v49, %v1538_v3  ;;  %v1528_v13 = vsel %vm222_vm0, %v2793_v42, %v1511_v38  ;;  %v1543_v4 = vsel %vm1003_vm1, %v1529_v5, 0.0 }
 0x812   : > { %v1541_v40 = vsel %vm1003_vm1, %v1528_v13, 0.0 }
 0x813   : > { %v1542_v6 = vadd.f32 %v1541_v40, %v1540_v15 }
 0x815   : > { %v1544_v45 = vadd.f32 %v1543_v4, %v1542_v6 }
 0x817   : > { %v1545_v10 = vrot.slane %v1544_v45, 4 }
 0x819   : > { %v1546_v21 = vadd.f32 %v1545_v10, %v1544_v45 }
 0x81b   : > { %v1547_v28 = vrot.slane %v1546_v21, 2 }
 0x81d   : > { %v1548_v18 = vadd.f32 %v1547_v28, %v1546_v21 }
 0x81f   : > { %v1549_v56 = vrot.slane %v1548_v18, 1 }
 0x821   : > { %v1550_v58 = vadd.f32 %v1549_v56, %v1548_v18 }
 0x823   : > { %v1551_v50 = vmul.f32 0.015625, %v1550_v58 }
 0x825   : > { %1561 = vrot.lane.b32.xlu0 %v1551_v50, %s2187_s23  ;;  %v1553_v57 = vsub.f32 %v2754_v54, %v1551_v50  ;;  %v1552_v60 = vsub.f32 %v2756_v26, %v1551_v50  ;;  %v1554_v12 = vsub.f32 %v2769_v14, %v1551_v50  ;;  %v1555_v59 = vsub.f32 %v2766_v16, %v1551_v50 }
 0x826   : > { %v1556_v61 = vsub.f32 %v2783_v29, %v1551_v50  ;;  %v1557_v47 = vsub.f32 %v2780_v48, %v1551_v50  ;;  %v1558_v62 = vsub.f32 %v2793_v42, %v1551_v50  ;;  %v1559_v11 = vsub.f32 %v2790_v44, %v1551_v50 }
 0x897   : > { %v1562_v33 = vpop.permute.xlu0 %1561 }
 0x898   : > { %v1565_v17 = vmul.f32 %v1562_v33, %v2283_v39  ;;  %v1564_v36 = vmul.f32 %v1562_v33, %v2304_v46  ;;  %v1566_v54 = vmul.f32 %v1562_v33, %v2914_v51  ;;  %v1567_v26 = vmul.f32 %v1562_v33, %v2912_v9 }
 0x899   : > { %v1568_v14 = vmul.f32 %v1562_v33, %v2917_v7  ;;  %v1569_v16 = vmul.f32 %v1562_v33, %v2916_v20  ;;  %v1570_v29 = vmul.f32 %v1562_v33, %v2919_v43  ;;  %v1571_v48 = vmul.f32 %v1562_v33, %v2918_v37 }
 0x89a   : > { %v1573_v27 = vsub.f32 %v1553_v57, %v1565_v17  ;;  %v1572_v42 = vsub.f32 %v1552_v60, %v1564_v36  ;;  %v1574_v19 = vsub.f32 %v1554_v12, %v1566_v54  ;;  %v1575_v44 = vsub.f32 %v1555_v59, %v1567_v26 }
 0x89b   : > { %v1576_v0 = vsub.f32 %v1556_v61, %v1568_v14  ;;  %v1577_v39 = vsub.f32 %v1557_v47, %v1569_v16  ;;  %v1578_v8 = vsub.f32 %v1558_v62, %v1570_v29  ;;  %v1579_v46 = vsub.f32 %v1559_v11, %v1571_v48 }
 0x89c   : > { %v1584_v32 = vmul.f32 %v1583_v23, %v1572_v42  ;;  %v1585_v51 = vmul.f32 %v1583_v23, %v1573_v27  ;;  %v1586_v9 = vmul.f32 %v1583_v23, %v1574_v19  ;;  %v1587_v25 = vmul.f32 %v1583_v23, %v1575_v44 }
 0x89d   : > { %v1588_v7 = vmul.f32 %v1583_v23, %v1576_v0  ;;  %v1589_v52 = vmul.f32 %v1583_v23, %v1577_v39  ;;  %v1590_v20 = vmul.f32 %v1583_v23, %v1578_v8  ;;  %v1591_v41 = vmul.f32 %v1583_v23, %v1579_v46 }
 0x89e   : > { %2052 = vmatprep.mubr.msk.f32.mxu1 %vm222_vm0, %v1584_v32 }
 0x89f   : > { %2053 = vmatmul.mubr.msk.f32.vlgmr.msra.gmra.mrb[16].mxu1 %vm222_vm0, %v1585_v51 }
 0x8a0   : > { %2055 = vmatprep.mubr.msk.f32.mxu1 %vm222_vm0, %v1586_v9 }
 0x8a3   : > { %2056 = vmatmul.mubr.msk.f32.gmra.mrb[18].mxu1 %vm222_vm0, %v1587_v25 }
 0x8a4   : > { %2058 = vmatprep.mubr.msk.f32.mxu1 %vm222_vm0, %v1588_v7 }
 0x8a7   : > { %2059 = vmatmul.mubr.msk.f32.gmra.mrb[20].mxu1 %vm222_vm0, %v1589_v52 }
 0x8a8   : > { %2061 = vmatprep.mubr.msk.f32.mxu1 %vm222_vm0, %v1590_v20 }
 0x8ab   : > { %2062 = vmatmul.mubr.msk.f32.gmra.mrb[22].mxu1 %vm222_vm0, %v1591_v41 }
 0x972   : > { %v2054_v37 = vpop.f32.mrb[16].mxu1 }
 0x973   : > { %1722 = vst.msk [vmem:[%s170_s19 + $0x8] sm:$0xff] %vm222_vm0, %v2054_v37  ;;  %v1682_v43 = vpop.f32.mrb[17].mxu1 }
 0x974   : > { %1721 = vst.msk [vmem:[%s170_s19] sm:$0xff] %vm222_vm0, %v1682_v43 }
 0x976   : > { %v2057_v35 = vpop.f32.mrb[18].mxu1 }
 0x977   : > { %1724 = vst.msk [vmem:[%s170_s19 + $0x18] sm:$0xff] %vm222_vm0, %v2057_v35  ;;  %v1692_v55 = vpop.f32.mrb[19].mxu1 }
 0x978   : > { %1723 = vst.msk [vmem:[%s170_s19 + $0x10] sm:$0xff] %vm222_vm0, %v1692_v55 }
 0x97a   : > { %v2060_v34 = vpop.f32.mrb[20].mxu1 }
 0x97b   : > { %1726 = vst.msk [vmem:[%s170_s19 + $0x28] sm:$0xff] %vm222_vm0, %v2060_v34  ;;  %v1702_v63 = vpop.f32.mrb[21].mxu1 }
 0x97c   : > { %1725 = vst.msk [vmem:[%s170_s19 + $0x20] sm:$0xff] %vm222_vm0, %v1702_v63 }
 0x97e   : > { %v2063_v1 = vpop.f32.mrb[22].mxu1 }
 0x97f   : > { %1728 = vst.msk [vmem:[%s170_s19 + $0x38] sm:$0xff] %vm222_vm0, %v2063_v1  ;;  %v1712_v22 = vpop.f32.mrb[23].mxu1 }
 0x980   : > { %1727 = vst.msk [vmem:[%s170_s19 + $0x30] sm:$0xff] %vm222_vm0, %v1712_v22 }
 0x981 PF: > { %s13_s12 = sadd.s32 1, %s2184_s12  }
 0x982   : > { %p10_p4 = scmp.ge.s32.totalorder %s13_s12, 10  }
 0x984   :  { %12 = sbr.rel (!%p10_p4) target bundleno = 1 (0x1), region = 67 }

</bundles_post_ra>
